<compile_context>
chip_gen: v7x
topology: tpu7x:2x2x1
jax: 0.10.0
libtpu: 0.0.40
codegen_flags: <defaults>
</compile_context>

<pallas_src>
import functools

import jax
import jax.numpy as jnp
from jax.experimental import pallas as pl
from jax.experimental.pallas import tpu as pltpu


def _round_up(x, m):
    return ((x + m - 1) // m) * m


def _pad2d(x, rows, cols):
    return jnp.pad(x, ((0, rows - x.shape[0]), (0, cols - x.shape[1])))


# ---------------------------------------------------------------------------
# Fused kernel for one destination node type.
# Refs (after squeezing the leading etype axis of the stacked inputs):
#   a_ref      (tile_m, tile_k)   bf16   adjacency tile of etype e (exact 0/1)
#   hsrc_ref   (tile_k, in_pad)   bf16   raw source features of etype e
#   invdeg_ref (tile_m, 1)        f32    1/in_degree (0 for isolated dst nodes)
#   w_ref      (in_pad, out_pad)  f32    W_e^T (pre-transposed)
#   b_ref      (1, out_pad)       f32    b_e
#   hdst_ref   (tile_m, in_pad)   f32    destination-node features (self loop)
#   wself_ref  (in_pad, out_pad)  f32    W_self^T
#   bself_ref  (1, out_pad)       f32    b_self
#   o_ref      (tile_m, out_pad)  f32    output tile
# Scratch:
#   acc_agg    (tile_m, in_pad)   f32    running  A_e @ H_src  over src tiles
#   acc_out    (tile_m, out_pad)  f32    running sum over etypes of neigh_e
# ---------------------------------------------------------------------------
def _fused_rgcn_kernel(a_ref, hsrc_ref, invdeg_ref, w_ref, b_ref,
                       hdst_ref, wself_ref, bself_ref, o_ref,
                       acc_agg, acc_out, *, inv_k):
    e = pl.program_id(1)
    s = pl.program_id(2)
    n_e = pl.num_programs(1)
    n_s = pl.num_programs(2)

    @pl.when(jnp.logical_and(e == 0, s == 0))
    def _init_out():
        acc_out[...] = jnp.zeros_like(acc_out)

    @pl.when(s == 0)
    def _init_agg():
        acc_agg[...] = jnp.zeros_like(acc_agg)

    # copy_u + (partial) sum over in-edges for this src tile.
    # bf16 x bf16 -> f32 accumulation is the MXU fast path; the 0/1 adjacency is
    # exact in bf16, so only the (pre-rounded) source features carry bf16 error.
    acc_agg[...] += jnp.dot(a_ref[...], hsrc_ref[...],
                            preferred_element_type=jnp.float32)

    @pl.when(s == n_s - 1)
    def _finish_etype():
        inv_deg = invdeg_ref[...]                          # (tile_m, 1)
        agg = acc_agg[...] * inv_deg                       # mean over in-edges
        mask = (inv_deg > 0.0).astype(jnp.float32)         # neigh==0 if isolated
        acc_out[...] += (jnp.dot(agg, w_ref[...],
                                 preferred_element_type=jnp.float32)
                         + b_ref[...] * mask)

    @pl.when(jnp.logical_and(e == n_e - 1, s == n_s - 1))
    def _finalize():
        h_self = (jnp.dot(hdst_ref[...], wself_ref[...],
                          preferred_element_type=jnp.float32) + bself_ref[...])
        o_ref[...] = acc_out[...] * inv_k + h_self


# ---------------------------------------------------------------------------
# Wrapper for one destination node type: builds padded/stacked operands and
# launches the fused, tiled pallas_call.
# ---------------------------------------------------------------------------
def _fused_dst_forward(a_list, inv_deg_list, h_src_list, wT_list, b_list,
                       h_dst, wself_T, b_self, out_dim,
                       *, tile_m_max=512, tile_k_max=512):
    assert tile_m_max % 16 == 0, "tile_m must keep bf16 sublane alignment"
    assert tile_k_max % 128 == 0, "tile_k must be lane-aligned when tiling src"

    k = len(a_list)
    n_dst, in_dim = h_dst.shape
    in_pad = _round_up(in_dim, 128)       # lane-dense contraction dim
    out_pad = _round_up(out_dim, 128)     # lane-dense output (unmasked vst)

    # dst-row tiling (parallel grid axis -> both TCs get work on v7x)
    if n_dst <= tile_m_max:
        tile_m = _round_up(n_dst, 16)
        n_dst_pad = tile_m
    else:
        tile_m = tile_m_max
        n_dst_pad = _round_up(n_dst, tile_m)

    # src-column (reduction) tiling
    n_src_max = max(h.shape[0] for h in h_src_list)
    if n_src_max <= tile_k_max:
        tile_k = _round_up(n_src_max, 16)
        n_src_pad = tile_k                # single src block (full dim)
    else:
        tile_k = tile_k_max               # multiple of 128
        n_src_pad = _round_up(n_src_max, tile_k)

    # Stack per-etype operands (padding is zero -> contributes nothing).
    # NOTE: in a real deployment these padded/stacked buffers are built once
    # per model, not per forward call.
    a_stack = jnp.stack(
        [_pad2d(a, n_dst_pad, n_src_pad) for a in a_list]).astype(jnp.bfloat16)
    inv_deg_stack = jnp.stack(
        [jnp.pad(d, (0, n_dst_pad - d.shape[0])).reshape(n_dst_pad, 1)
         for d in inv_deg_list]).astype(jnp.float32)
    h_src_stack = jnp.stack(
        [_pad2d(h, n_src_pad, in_pad) for h in h_src_list]).astype(jnp.bfloat16)
    wT_stack = jnp.stack([_pad2d(w, in_pad, out_pad) for w in wT_list])
    b_stack = jnp.stack(
        [jnp.pad(b, (0, out_pad - b.shape[0])).reshape(1, out_pad) for b in b_list])
    h_dst_p = _pad2d(h_dst, n_dst_pad, in_pad)
    wself_p = _pad2d(wself_T, in_pad, out_pad)
    bself_p = jnp.pad(b_self, (0, out_pad - b_self.shape[0])).reshape(1, out_pad)

    grid = (n_dst_pad // tile_m, k, n_src_pad // tile_k)

    kernel = functools.partial(_fused_rgcn_kernel, inv_k=1.0 / k)

    out = pl.pallas_call(
        kernel,
        out_shape=jax.ShapeDtypeStruct((n_dst_pad, out_pad), jnp.float32),
        grid_spec=pltpu.PrefetchScalarGridSpec(
            num_scalar_prefetch=0,
            grid=grid,
            in_specs=[
                # adjacency tile of etype e
                pl.BlockSpec((None, tile_m, tile_k), lambda i, e, s: (e, i, s)),
                # raw source features of etype e
                pl.BlockSpec((None, tile_k, in_pad), lambda i, e, s: (e, s, 0)),
                # precomputed 1/in_degree
                pl.BlockSpec((None, tile_m, 1), lambda i, e, s: (e, i, 0)),
                # per-etype W^T and bias
                pl.BlockSpec((None, in_pad, out_pad), lambda i, e, s: (e, 0, 0)),
                pl.BlockSpec((None, 1, out_pad), lambda i, e, s: (e, 0, 0)),
                # self-loop inputs
                pl.BlockSpec((tile_m, in_pad), lambda i, e, s: (i, 0)),
                pl.BlockSpec((in_pad, out_pad), lambda i, e, s: (0, 0)),
                pl.BlockSpec((1, out_pad), lambda i, e, s: (0, 0)),
            ],
            out_specs=pl.BlockSpec((tile_m, out_pad), lambda i, e, s: (i, 0)),
            scratch_shapes=[pltpu.VMEM((tile_m, in_pad), jnp.float32),
                            pltpu.VMEM((tile_m, out_pad), jnp.float32)],
        ),
        compiler_params=pltpu.CompilerParams(
            dimension_semantics=("parallel", "arbitrary", "arbitrary"),
            vmem_limit_bytes=32 * 1024 * 1024,   # safe on v5e/v6e/v7x; usage ~4 MiB
        ),
    )(a_stack, h_src_stack, inv_deg_stack, wT_stack, b_stack,
      h_dst_p, wself_p, bself_p)

    return out[:n_dst, :out_dim]


# ---------------------------------------------------------------------------
# HeteroRGCN forward: one fused pallas_call per destination node type.
# ---------------------------------------------------------------------------
def hetero_rgcn_forward(canonical_etypes, adj, ntype2h, etype2w,
                        ntype2selfloop_w, *, tile_m_max=512, tile_k_max=512):
    out = {}
    for nt, h_dst in ntype2h.items():
        incoming = [(src, et) for (src, et, d) in canonical_etypes if d == nt]
        # DGL's multi_update_all only defines h_neigh for ntypes with in-edges.
        assert incoming, f"node type {nt!r} has no incoming edge types"

        a_list, inv_deg_list, h_src_list, wT_list, b_list = [], [], [], [], []
        for (src, et) in incoming:
            a = adj[(src, et, nt)].astype(jnp.float32)
            deg = a.sum(axis=-1)
            inv_deg_list.append(jnp.where(deg > 0, 1.0 / jnp.maximum(deg, 1.0), 0.0))
            a_list.append(a)
            h_src_list.append(ntype2h[src])
            w, b = etype2w[et]
            wT_list.append(w.T)            # pre-transpose once (no in-kernel .T)
            b_list.append(b)

        w_s, b_s = ntype2selfloop_w[nt]
        out[nt] = _fused_dst_forward(
            a_list, inv_deg_list, h_src_list, wT_list, b_list,
            h_dst, w_s.T, b_s, w_s.shape[0],
            tile_m_max=tile_m_max, tile_k_max=tile_k_max)
    return out


# ---------------------------------------------------------------------------
# pure-JAX reference (original project-then-aggregate order, f32 everywhere)
# ---------------------------------------------------------------------------
def reference_forward(canonical_etypes, adj, ntype2h, etype2w, ntype2selfloop_w):
    ntype2neigh = {nt: [] for nt in ntype2h}
    for (src, etype, dst) in canonical_etypes:
        w, b = etype2w[etype]
        h_e = ntype2h[src] @ w.T + b
        a = adj[(src, etype, dst)]
        deg = a.sum(-1, keepdims=True)
        neigh = jnp.where(deg > 0, (a @ h_e) / jnp.maximum(deg, 1.0), 0.0)
        ntype2neigh[dst].append(neigh)
    out = {}
    for nt, h in ntype2h.items():
        w, b = ntype2selfloop_w[nt]
        h_self = h @ w.T + b
        out[nt] = jnp.mean(jnp.stack(ntype2neigh[nt], 0), axis=0) + h_self
    return out


# ---------------------------------------------------------------------------
if __name__ == "__main__":
    in_dim, out_dim = 64, 48          # non-multiples of 128 -> exercises lane padding
    n_drug, n_gene = 160, 96
    ntypes = ["drug", "gene"]
    canonical_etypes = [
        ("drug", "dd", "drug"),
        ("drug", "dg", "gene"),
        ("gene", "gd", "drug"),
        ("gene", "gg", "gene"),
    ]
    n_of = {"drug": n_drug, "gene": n_gene}

    key = jax.random.PRNGKey(0)

    def init_linear(k, in_d, out_d):
        kw, kb = jax.random.split(k)
        bound = 1.0 / (in_d ** 0.5)
        w = jax.random.uniform(kw, (out_d, in_d), jnp.float32, -bound, bound)
        b = jax.random.uniform(kb, (out_d,), jnp.float32, -bound, bound)
        return w, b

    keys = jax.random.split(key, 16)
    ki = iter(keys)

    etype2w = {e: init_linear(next(ki), in_dim, out_dim)
               for (_, e, _) in canonical_etypes}
    ntype2selfloop_w = {nt: init_linear(next(ki), in_dim, out_dim)
                        for nt in ntypes}
    ntype2h = {nt: jax.random.normal(next(ki), (n_of[nt], in_dim), jnp.float32)
               for nt in ntypes}

    adj = {}
    for ce in canonical_etypes:
        src, _, dst = ce
        adj[ce] = jax.random.bernoulli(
            next(ki), 0.3, (n_of[dst], n_of[src])).astype(jnp.float32)
    # make a few drug nodes isolated w.r.t. the gd etype to exercise deg==0 masking
    adj[("gene", "gd", "drug")] = adj[("gene", "gd", "drug")].at[:4].set(0.0)

    # small tile caps so the demo exercises multi-tile grids on both the
    # parallel dst axis and the src reduction axis
    out = hetero_rgcn_forward(canonical_etypes, adj, ntype2h,
                              etype2w, ntype2selfloop_w,
                              tile_m_max=64, tile_k_max=128)
    for v in out.values():
        jax.block_until_ready(v)

    ref = reference_forward(canonical_etypes, adj, ntype2h,
                            etype2w, ntype2selfloop_w)
    for nt in ntypes:
        assert out[nt].shape == (n_of[nt], out_dim)
        # aggregation path streams bf16 source features (MXU fast path), hence
        # a slightly wider atol than a pure-f32 comparison would need
        assert jnp.allclose(out[nt], ref[nt], atol=2e-3, rtol=1e-3), nt

    print("KERNEL_OK")
</pallas_src>

<mosaic_0001>
module attributes {stable_mosaic.version = 11 : i64} {
  func.func @_fused_rgcn_kernel(%arg0: i32, %arg1: i32, %arg2: i32, %arg3: memref<1x64x128xbf16, #tpu.memory_space<vmem>>, %arg4: memref<1x128x128xbf16, #tpu.memory_space<vmem>>, %arg5: memref<1x64x1xf32, #tpu.memory_space<vmem>>, %arg6: memref<1x128x128xf32, #tpu.memory_space<vmem>>, %arg7: memref<1x1x128xf32, #tpu.memory_space<vmem>>, %arg8: memref<64x128xf32, #tpu.memory_space<vmem>>, %arg9: memref<128x128xf32, #tpu.memory_space<vmem>>, %arg10: memref<1x128xf32, #tpu.memory_space<vmem>>, %arg11: memref<64x128xf32, #tpu.memory_space<vmem>>, %arg12: memref<64x128xf32, #tpu.memory_space<vmem>>, %arg13: memref<64x128xf32, #tpu.memory_space<vmem>>) attributes {dimension_semantics = [#tpu.dimension_semantics<parallel>, #tpu.dimension_semantics<arbitrary>, #tpu.dimension_semantics<arbitrary>], iteration_bounds = array<i64: 3, 2, 2>, scalar_prefetch = 0 : i64, scratch_operands = 2 : i64, tpu.core_type = #tpu.core_type<tc>, window_params = [{transform_indices = @transform_0, window_bounds = array<i64: 1, 64, 128>}, {transform_indices = @transform_1, window_bounds = array<i64: 1, 128, 128>}, {transform_indices = @transform_2, window_bounds = array<i64: 1, 64, 1>}, {transform_indices = @transform_3, window_bounds = array<i64: 1, 128, 128>}, {transform_indices = @transform_4, window_bounds = array<i64: 1, 1, 128>}, {transform_indices = @transform_5, window_bounds = array<i64: 64, 128>}, {pipeline_mode = #tpu.pipeline_mode<synchronous>, transform_indices = @transform_6, window_bounds = array<i64: 128, 128>}, {pipeline_mode = #tpu.pipeline_mode<synchronous>, transform_indices = @transform_7, window_bounds = array<i64: 1, 128>}, {transform_indices = @transform_8, window_bounds = array<i64: 64, 128>}]} {
    %c0_i32 = arith.constant 0 : i32
    %0 = arith.cmpi eq, %arg1, %c0_i32 : i32
    %c0_i32_0 = arith.constant 0 : i32
    %1 = arith.cmpi eq, %arg2, %c0_i32_0 : i32
    %2 = arith.andi %0, %1 : i1
    %3 = arith.extui %2 : i1 to i32
    %c0_i32_1 = arith.constant 0 : i32
    %4 = arith.cmpi ne, %3, %c0_i32_1 : i32
    scf.if %4 {
      %cst_17 = arith.constant 0.000000e+00 : f32
      %24 = vector.broadcast %cst_17 : f32 to vector<64x128xf32>
      %c0_18 = arith.constant 0 : index
      %c0_19 = arith.constant 0 : index
      %25 = vector.load %arg13[%c0_18, %c0_19] : memref<64x128xf32, #tpu.memory_space<vmem>>, vector<64x128xf32>
      tpu.vector_store %arg13[%c0_18, %c0_19], %24 {strides = array<i32>} : memref<64x128xf32, #tpu.memory_space<vmem>>, vector<64x128xf32>,
    } else {
    }
    %c0_i32_2 = arith.constant 0 : i32
    %5 = arith.cmpi eq, %arg2, %c0_i32_2 : i32
    %6 = arith.extui %5 : i1 to i32
    %c0_i32_3 = arith.constant 0 : i32
    %7 = arith.cmpi ne, %6, %c0_i32_3 : i32
    scf.if %7 {
      %cst_17 = arith.constant 0.000000e+00 : f32
      %24 = vector.broadcast %cst_17 : f32 to vector<64x128xf32>
      %c0_18 = arith.constant 0 : index
      %c0_19 = arith.constant 0 : index
      %25 = vector.load %arg12[%c0_18, %c0_19] : memref<64x128xf32, #tpu.memory_space<vmem>>, vector<64x128xf32>
      tpu.vector_store %arg12[%c0_18, %c0_19], %24 {strides = array<i32>} : memref<64x128xf32, #tpu.memory_space<vmem>>, vector<64x128xf32>,
    } else {
    }
    %c0 = arith.constant 0 : index
    %c0_4 = arith.constant 0 : index
    %8 = vector.load %arg12[%c0, %c0_4] : memref<64x128xf32, #tpu.memory_space<vmem>>, vector<64x128xf32>
    %c0_5 = arith.constant 0 : index
    %c0_6 = arith.constant 0 : index
    %c0_7 = arith.constant 0 : index
    %9 = vector.load %arg3[%c0_5, %c0_6, %c0_7] : memref<1x64x128xbf16, #tpu.memory_space<vmem>>, vector<1x64x128xbf16>
    %10 = vector.shape_cast %9 : vector<1x64x128xbf16> to vector<64x128xbf16>
    %c0_8 = arith.constant 0 : index
    %c0_9 = arith.constant 0 : index
    %c0_10 = arith.constant 0 : index
    %11 = vector.load %arg4[%c0_8, %c0_9, %c0_10] : memref<1x128x128xbf16, #tpu.memory_space<vmem>>, vector<1x128x128xbf16>
    %12 = vector.shape_cast %11 : vector<1x128x128xbf16> to vector<128x128xbf16>
    %cst = arith.constant dense<0.000000e+00> : vector<64x128xf32>
    %13 = tpu.matmul %10, %12, %cst {dimension_numbers = #tpu.dot_dimension_numbers<[1], [0], [0], [1], [0, 0, 1, 1], [], []>} : vector<64x128xbf16>, vector<128x128xbf16>, vector<64x128xf32> -> vector<64x128xf32>
    %14 = arith.addf %8, %13 : vector<64x128xf32>
    %c0_11 = arith.constant 0 : index
    %c0_12 = arith.constant 0 : index
    %15 = vector.load %arg12[%c0_11, %c0_12] : memref<64x128xf32, #tpu.memory_space<vmem>>, vector<64x128xf32>
    tpu.vector_store %arg12[%c0_11, %c0_12], %14 {strides = array<i32>} : memref<64x128xf32, #tpu.memory_space<vmem>>, vector<64x128xf32>,
    %c1_i32 = arith.constant 1 : i32
    %16 = arith.cmpi eq, %arg2, %c1_i32 : i32
    %17 = arith.extui %16 : i1 to i32
    %c0_i32_13 = arith.constant 0 : i32
    %18 = arith.cmpi ne, %17, %c0_i32_13 : i32
    scf.if %18 {
      %c0_17 = arith.constant 0 : index
      %c0_18 = arith.constant 0 : index
      %c0_19 = arith.constant 0 : index
      %24 = vector.load %arg5[%c0_17, %c0_18, %c0_19] : memref<1x64x1xf32, #tpu.memory_space<vmem>>, vector<1x64x1xf32>
      %25 = vector.shape_cast %24 : vector<1x64x1xf32> to vector<64x1xf32>
      %c0_20 = arith.constant 0 : index
      %c0_21 = arith.constant 0 : index
      %26 = vector.load %arg12[%c0_20, %c0_21] : memref<64x128xf32, #tpu.memory_space<vmem>>, vector<64x128xf32>
      %27 = vector.broadcast %25 : vector<64x1xf32> to vector<64x128xf32>
      %28 = arith.mulf %26, %27 : vector<64x128xf32>
      %cst_22 = arith.constant 0.000000e+00 : f32
      %29 = vector.broadcast %cst_22 : f32 to vector<64x1xf32>
      %30 = arith.cmpf ogt, %25, %29 : vector<64x1xf32>
      %31 = arith.extui %30 : vector<64x1xi1> to vector<64x1xi32>
      %32 = arith.sitofp %31 : vector<64x1xi32> to vector<64x1xf32>
      %c0_23 = arith.constant 0 : index
      %c0_24 = arith.constant 0 : index
      %33 = vector.load %arg13[%c0_23, %c0_24] : memref<64x128xf32, #tpu.memory_space<vmem>>, vector<64x128xf32>
      %c0_25 = arith.constant 0 : index
      %c0_26 = arith.constant 0 : index
      %c0_27 = arith.constant 0 : index
      %34 = vector.load %arg6[%c0_25, %c0_26, %c0_27] : memref<1x128x128xf32, #tpu.memory_space<vmem>>, vector<1x128x128xf32>
      %35 = vector.shape_cast %34 : vector<1x128x128xf32> to vector<128x128xf32>
      %cst_28 = arith.constant dense<0.000000e+00> : vector<64x128xf32>
      %36 = tpu.matmul %28, %35, %cst_28 {dimension_numbers = #tpu.dot_dimension_numbers<[1], [0], [0], [1], [0, 0, 1, 1], [], []>} : vector<64x128xf32>, vector<128x128xf32>, vector<64x128xf32> -> vector<64x128xf32>
      %c0_29 = arith.constant 0 : index
      %c0_30 = arith.constant 0 : index
      %c0_31 = arith.constant 0 : index
      %37 = vector.load %arg7[%c0_29, %c0_30, %c0_31] : memref<1x1x128xf32, #tpu.memory_space<vmem>>, vector<1x1x128xf32>
      %38 = vector.shape_cast %37 : vector<1x1x128xf32> to vector<1x128xf32>
      %39 = vector.broadcast %38 : vector<1x128xf32> to vector<64x128xf32>
      %40 = vector.broadcast %32 : vector<64x1xf32> to vector<64x128xf32>
      %41 = arith.mulf %39, %40 : vector<64x128xf32>
      %42 = arith.addf %36, %41 : vector<64x128xf32>
      %43 = arith.addf %33, %42 : vector<64x128xf32>
      %c0_32 = arith.constant 0 : index
      %c0_33 = arith.constant 0 : index
      %44 = vector.load %arg13[%c0_32, %c0_33] : memref<64x128xf32, #tpu.memory_space<vmem>>, vector<64x128xf32>
      tpu.vector_store %arg13[%c0_32, %c0_33], %43 {strides = array<i32>} : memref<64x128xf32, #tpu.memory_space<vmem>>, vector<64x128xf32>,
    } else {
    }
    %c1_i32_14 = arith.constant 1 : i32
    %19 = arith.cmpi eq, %arg1, %c1_i32_14 : i32
    %c1_i32_15 = arith.constant 1 : i32
    %20 = arith.cmpi eq, %arg2, %c1_i32_15 : i32
    %21 = arith.andi %19, %20 : i1
    %22 = arith.extui %21 : i1 to i32
    %c0_i32_16 = arith.constant 0 : i32
    %23 = arith.cmpi ne, %22, %c0_i32_16 : i32
    scf.if %23 {
      %c0_17 = arith.constant 0 : index
      %c0_18 = arith.constant 0 : index
      %24 = vector.load %arg8[%c0_17, %c0_18] : memref<64x128xf32, #tpu.memory_space<vmem>>, vector<64x128xf32>
      %c0_19 = arith.constant 0 : index
      %c0_20 = arith.constant 0 : index
      %25 = vector.load %arg9[%c0_19, %c0_20] : memref<128x128xf32, #tpu.memory_space<vmem>>, vector<128x128xf32>
      %cst_21 = arith.constant dense<0.000000e+00> : vector<64x128xf32>
      %26 = tpu.matmul %24, %25, %cst_21 {dimension_numbers = #tpu.dot_dimension_numbers<[1], [0], [0], [1], [0, 0, 1, 1], [], []>} : vector<64x128xf32>, vector<128x128xf32>, vector<64x128xf32> -> vector<64x128xf32>
      %c0_22 = arith.constant 0 : index
      %c0_23 = arith.constant 0 : index
      %27 = vector.load %arg10[%c0_22, %c0_23] : memref<1x128xf32, #tpu.memory_space<vmem>>, vector<1x128xf32>
      %28 = vector.broadcast %27 : vector<1x128xf32> to vector<64x128xf32>
      %29 = arith.addf %26, %28 : vector<64x128xf32>
      %c0_24 = arith.constant 0 : index
      %c0_25 = arith.constant 0 : index
      %30 = vector.load %arg13[%c0_24, %c0_25] : memref<64x128xf32, #tpu.memory_space<vmem>>, vector<64x128xf32>
      %cst_26 = arith.constant 5.000000e-01 : f32
      %31 = vector.broadcast %cst_26 : f32 to vector<64x128xf32>
      %32 = arith.mulf %30, %31 : vector<64x128xf32>
      %33 = arith.addf %32, %29 : vector<64x128xf32>
      %c0_27 = arith.constant 0 : index
      %c0_28 = arith.constant 0 : index
      %34 = vector.load %arg11[%c0_27, %c0_28] : memref<64x128xf32, #tpu.memory_space<vmem>>, vector<64x128xf32>
      tpu.vector_store %arg11[%c0_27, %c0_28], %33 {strides = array<i32>} : memref<64x128xf32, #tpu.memory_space<vmem>>, vector<64x128xf32>,
    } else {
    }
    return
  }
  func.func @transform_0(%arg0: i32, %arg1: i32, %arg2: i32) -> (i32, i32, i32) {
    %c0_i32 = arith.constant 0 : i32
    return %arg1, %arg0, %arg2 : i32, i32, i32
  }
  func.func @transform_1(%arg0: i32, %arg1: i32, %arg2: i32) -> (i32, i32, i32) {
    %c0_i32 = arith.constant 0 : i32
    %c0_i32_0 = arith.constant 0 : i32
    return %arg1, %arg2, %c0_i32 : i32, i32, i32
  }
  func.func @transform_2(%arg0: i32, %arg1: i32, %arg2: i32) -> (i32, i32, i32) {
    %c0_i32 = arith.constant 0 : i32
    %c0_i32_0 = arith.constant 0 : i32
    return %arg1, %arg0, %c0_i32 : i32, i32, i32
  }
  func.func @transform_3(%arg0: i32, %arg1: i32, %arg2: i32) -> (i32, i32, i32) {
    %c0_i32 = arith.constant 0 : i32
    %c0_i32_0 = arith.constant 0 : i32
    %c0_i32_1 = arith.constant 0 : i32
    return %arg1, %c0_i32, %c0_i32_0 : i32, i32, i32
  }
  func.func @transform_4(%arg0: i32, %arg1: i32, %arg2: i32) -> (i32, i32, i32) {
    %c0_i32 = arith.constant 0 : i32
    %c0_i32_0 = arith.constant 0 : i32
    %c0_i32_1 = arith.constant 0 : i32
    return %arg1, %c0_i32, %c0_i32_0 : i32, i32, i32
  }
  func.func @transform_5(%arg0: i32, %arg1: i32, %arg2: i32) -> (i32, i32) {
    %c0_i32 = arith.constant 0 : i32
    %c0_i32_0 = arith.constant 0 : i32
    return %arg0, %c0_i32 : i32, i32
  }
  func.func @transform_6(%arg0: i32, %arg1: i32, %arg2: i32) -> (i32, i32) {
    %c0_i32 = arith.constant 0 : i32
    %c0_i32_0 = arith.constant 0 : i32
    %c0_i32_1 = arith.constant 0 : i32
    return %c0_i32, %c0_i32_0 : i32, i32
  }
  func.func @transform_7(%arg0: i32, %arg1: i32, %arg2: i32) -> (i32, i32) {
    %c0_i32 = arith.constant 0 : i32
    %c0_i32_0 = arith.constant 0 : i32
    %c0_i32_1 = arith.constant 0 : i32
    return %c0_i32, %c0_i32_0 : i32, i32
  }
  func.func @transform_8(%arg0: i32, %arg1: i32, %arg2: i32) -> (i32, i32) {
    %c0_i32 = arith.constant 0 : i32
    %c0_i32_0 = arith.constant 0 : i32
    return %arg0, %c0_i32 : i32, i32
  }
}

</mosaic_0001>

<bundles_post_ra>
// kernel: tpu_custom_call.1
= control target key start
LH: loop header
LB: loop body
LE: loop exit
PB: predicated region body
PF: predicated region fallthrough
CT: control target
= control target key end

     0   :  { %s2967_s0 = inlined_call_operand.vmem [shape: bf16[2,192,256], index: 0, kind: input, shape index: {}]   ;;  %s2968_s1 = inlined_call_operand.hbm [shape: bf16[2,256,128], index: 1, kind: input, shape index: {}]   ;;  %s2969_s2 = inlined_call_operand.vmem [shape: f32[2,192,1], index: 2, kind: input, shape index: {}]   ;;  %s2970_s3 = inlined_call_operand.hbm [shape: f32[2,128,128], index: 3, kind: input, shape index: {}]   ;;  %s2971_s4 = inlined_call_operand.vmem [shape: f32[2,1,128], index: 4, kind: input, shape index: {}]   ;;  %s2972_s5 = inlined_call_operand.hbm [shape: f32[192,128], index: 5, kind: input, shape index: {}]   ;;  %s2973_s6 = inlined_call_operand.hbm [shape: f32[128,128], index: 6, kind: input, shape index: {}]   ;;  %s2974_s7 = inlined_call_operand.vmem [shape: f32[1,128], index: 7, kind: input, shape index: {}]   ;;  %s2975_s8 = inlined_call_operand.hbm [shape: f32[192,128], index: 8, kind: output, shape index: {}]  }
   0x1   :  { %3009 = sst [smem:[#allocation40_spill]] %s2967_s0 }
   0x2   :  { %3010 = sst [smem:[#allocation41_spill]] %s2969_s2 }
   0x3   :  { %3011 = sst [smem:[#allocation42_spill]] %s2970_s3 }
   0x4   :  { %3012 = sst [smem:[#allocation43_spill]] %s2971_s4 }
   0x5   :  { %3013 = sst [smem:[#allocation44_spill]] %s2974_s7 }
   0x6   :  { %3014 = sst [smem:[#allocation45_spill]] %s2975_s8 }
   0x7   :  { %13 = vsyncpa [#allocation6], 0 }
   0x8   :  { %15 = vsyncpa [#allocation6 + $0x1], 0 }
   0x9   :  { %16 = vsyncpa [#allocation9], 0 }
   0xa   :  { %18 = vsyncpa [#allocation9 + $0x1], 0 }
   0xb   :  { %19 = vsyncpa [#allocation12], 0 }
   0xc   :  { %20 = vsyncpa [#allocation7], 0 }
   0xd   :  { %22 = vsyncpa [#allocation7 + $0x1], 0  ;;  %s2403_s27 = smov 0   ;;  %s2405_s28 = smov 0  }
   0xe   :  { %s2407_s29 = smov 0   ;;  %s2409_s30 = smov 0  }
   0xf   :  { %s2411_s9 = smov 0   ;;  %s2413_s10 = smov 0  }
  0x10   :  { %s2415_s11 = smov 0   ;;  %s2417_s12 = smov 0  }
  0x11   :  { %s2419_s13 = smov 0   ;;  %s2421_s14 = smov 0  }
  0x12   :  { %s2423_s15 = smov 0   ;;  %s2425_s16 = smov 0  }
  0x13   :  { %s2427_s17 = smov 0   ;;  %s2429_s18 = smov 0  }
  0x14   :  { %s2431_s19 = smov 0   ;;  %s2433_s20 = smov 0  }
  0x15   :  { %s2435_s21 = smov 0   ;;  %s2437_s22 = smov 0  }
  0x16 LB: > { %3015 = sst [smem:[#allocation19_spill]] %s2271_s27  ;;  %s2494_s23 = sadd.s32 4294967295, %s2339_s22   ;;  %s2339_s22 = sphi %s2437_s22, %s28_s22   ;;  %s2335_s21 = sphi %s2435_s21, %s3114_s21   ;;  %s2331_s20 = sphi %s2433_s20, %s3113_s20   ;;  %s2327_s19 = sphi %s2431_s19, %s3112_s19   ;;  %s2323_s18 = sphi %s2429_s18, %s3111_s18   ;;  %s2319_s17 = sphi %s2427_s17, %s3110_s17   ;;  %s2315_s16 = sphi %s2425_s16, %s3109_s16   ;;  %s2311_s15 = sphi %s2423_s15, %s3108_s15   ;;  %s2307_s14 = sphi %s2421_s14, %s3107_s14   ;;  %s2303_s13 = sphi %s2419_s13, %s3106_s13   ;;  %s2299_s12 = sphi %s2417_s12, %s3105_s12   ;;  %s2295_s11 = sphi %s2415_s11, %s3094_s11   ;;  %s2291_s10 = sphi %s2413_s10, %s3104_s10   ;;  %s2287_s9 = sphi %s2411_s9, %s3103_s9   ;;  %s2283_s30 = sphi %s2409_s30, %s3092_s30   ;;  %s2279_s29 = sphi %s2407_s29, %s3101_s29   ;;  %s2275_s28 = sphi %s2405_s28, %s3100_s28   ;;  %s2271_s27 = sphi %s2403_s27, %s3090_s27  }
  0x17   : > { %3016 = sst [smem:[#allocation20_spill]] %s2275_s28  ;;  %s40_s25 = sadd.s32 1, %s2327_s19 }
  0x18   : > { %3017 = sst [smem:[#allocation21_spill]] %s2287_s9  ;;  %s43_s26 = sadd.s32 1, %s2331_s20 }
  0x19   : > { %3018 = sst [smem:[#allocation22_spill]] %s2299_s12  ;;  %p41_p0 = scmp.ge.s32.totalorder %s40_s25, 2 }
  0x1a   : > { %3019 = sst [smem:[#allocation23_spill]] %s2307_s14  ;;  %s47_s8 = sadd.s32 1, %s2335_s21 }
  0x1b   : > { %3020 = sst [smem:[#allocation24_spill]] %s2315_s16  ;;  %p65_p1 = scmp.ne.s32.totalorder %s2311_s15, %s2307_s14 }
  0x1c   : > { %3021 = sst [smem:[#allocation25_spill]] %s2319_s17  ;;  %s3116_s25 = smov (%p41_p0, %s40_s25), 0 }
  0x1d   : > { %3022 = sst [smem:[#allocation26_spill]] %s2323_s18  ;;  %s3118_s26 = smov (!%p41_p0, %s43_s26), %s2331_s20 }
  0x1e   : > { %3023 = sst [smem:[#allocation27_spill]] %s2494_s23  ;;  %s54_s2 = ssub.s32 %s2327_s19, %s3116_s25 }
  0x1f   : > { %3024 = sst [smem:[#allocation28_spill]] %s3116_s25  ;;  %p66_p2 = scmp.eq.s32.totalorder %s2339_s22, 0 }
  0x20   : > { %p45_p3 = scmp.ge.s32.totalorder %s3118_s26, 2  ;;  %s86_s24 = sadd.s32 1, %s2303_s13 }
  0x21   : > { %p2512_p4 = por %p66_p2, %p65_p1  ;;  %p93_p5 = scmp.ne.s32.totalorder %s2303_s13, %s2299_s12 }
  0x22   : > { %s3120_s26 = smov (%p45_p3, %s3118_s26), 0  ;;  %s3122_s8 = smov (!%p45_p3, %s47_s8), %s2335_s21 }
  0x23   : > { %s3025_s4 = scalar_select %p2512_p4, 1, 0 }
  0x24   : > { %3026 = sst [smem:[#allocation29_spill]] %s3120_s26  ;;  %s51_s7 = ssub.s32 %s2331_s20, %s3120_s26 }
  0x25   : > { %p2525_p6 = por %p93_p5, %p66_p2  ;;  %p49_p7 = scmp.ge.s32.totalorder %s3122_s8, 3 }
  0x26   : > { %s83_s16 = sor.u32 %s54_s2, %s51_s7  ;;  %p99_p9 = scmp.ne.s32.totalorder %s2299_s12, %s2295_s11 }
  0x27   : > { %s3027_s25 = scalar_select %p2525_p6, 1, 0 }
  0x28   : > { %p84_p8 = scmp.eq.s32.totalorder %s83_s16, 0  ;;  %s3124_s8 = smov (%p49_p7, %s3122_s8), 0 }
  0x29   : > { %3028 = sst [smem:[#allocation30_spill]] %s3124_s8  ;;  %s52_s17 = ssub.s32 %s2335_s21, %s3124_s8 }
  0x2a   : > { %s2534_s26 = scalar_select %p84_p8, %s2303_s13, %s86_s24  }
  0x2b   : > { %p2998_p10 = scmp.eq.s32.totalorder %s2494_s23, 0  ;;  %s53_s18 = sor.u32 %s52_s17, %s51_s7 }
  0x2c   : > { %3029 = sst [smem:[#allocation31_spill]] %s2534_s26  ;;  %p138_p11 = scmp.eq.s32.totalorder %s51_s7, 0 }
  0x2d   : > { %s55_s16 = sor.u32 %s54_s2, %s53_s18  ;;  %p2541_p12 = por %p2998_p10, %p99_p9 }
  0x2e   : > { %p56_p13 = scmp.eq.s32.totalorder %s55_s16, 0  ;;  %s140_s24 = sadd.s32 1, %s2291_s10 }
  0x2f   : > { %s3030_s11 = scalar_select %p2541_p12, 1, 0 }
  0x30   : > { %s2547_s8 = scalar_select %p138_p11, %s2291_s10, %s140_s24  }
  0x31   : > { %3031 = sst [smem:[#allocation32_spill]] %s3030_s11  ;;  %s3033_s26 = sadd.s32 1, %s2311_s15 }
  0x32   : > { %3032 = sst [smem:[#allocation33_spill]] %s2547_s8  ;;  %p147_p0 = scmp.ne.s32.totalorder %s2291_s10, %s2287_s9 }
  0x33   : > { %s2552_s12 = scalar_select %p56_p13, %s2311_s15, %s3033_s26  }
  0x34   : > { %p153_p1 = scmp.ne.s32.totalorder %s2287_s9, %s2283_s30  ;;  %p190_p3 = scmp.eq.s32.totalorder %s52_s17, 0 }
  0x35   : > { %3034 = sst [smem:[#allocation34_spill]] %s2552_s12  ;;  %s192_s2 = sadd.s32 1, %s2279_s29 }
  0x36   : > { %p2561_p5 = por %p147_p0, %p66_p2  ;;  %p2567_p7 = por %p153_p1, %p2998_p10 }
  0x37   : > { %s2572_s16 = scalar_select %p190_p3, %s2279_s29, %s192_s2  }
  0x38   : > { %s3035_s7 = scalar_select %p2561_p5, 1, 0 }
  0x39   : > { %s3036_s18 = scalar_select %p2567_p7, 1, 0 }
  0x3a   : > { %3038 = sst [smem:[#allocation36_spill]] %s2572_s16  ;;  %p199_p8 = scmp.ne.s32.totalorder %s2279_s29, %s2275_s28 }
  0x3b   : > { %3037 = sst [smem:[#allocation35_spill]] %s3036_s18  ;;  %p205_p9 = scmp.ne.s32.totalorder %s2275_s28, %s2271_s27 }
  0x3c   : > { %p271_p11 = scmp.eq.s32.totalorder %s2494_s23, 11  ;;  %s3039_s26 = sadd.s32 4294967294, %s2339_s22  }
  0x3d   : > { %p277_p13 = scmp.eq.s32.totalorder %s3039_s26, 11  ;;  %p2583_p12 = por %p199_p8, %p66_p2 }
  0x3e   : > { %p2589_p0 = por %p205_p9, %p2998_p10  ;;  %p2593_p1 = por %p271_p11, %p199_p8 }
  0x3f   : > { %s3040_s30 = scalar_select %p2583_p12, 1, 0 }
  0x40   : > { %s3041_s17 = scalar_select %p2589_p0, 1, 0 }
  0x41   : > { %s3043_s24 = scalar_select %p2593_p1, 1, 0 }
  0x42   : > { %3042 = sst [smem:[#allocation37_spill]] %s3041_s17  ;;  %p2597_p3 = por %p277_p13, %p205_p9 }
  0x43   : > { %3044 = sst [smem:[#allocation38_spill]] %s3043_s24  ;;  %p1478_p7 = scmp.ge.s32.totalorder %s2339_s22, 1 }
  0x44   : > { %s3045_s2 = scalar_select %p2597_p3, 1, 0 }
  0x45   : > { %p284_p6 = scmp.lt.s32.totalorder %s2339_s22, 13  ;;  %s2341_s12 = smov [#allocation11]  }
  0x46   : > { %3046 = sst [smem:[#allocation39_spill]] %s3045_s2  ;;  %s296_s8 = sshll.u32 %s2341_s12, 4  ;;  %s297_s8 = int_to_ptr.vmem [resolvable:$true] %s296_s8 }
  0x47   : > { %p2603_p5 = pnand %p1478_p7, %p284_p6  ;;  %s2037_s2 = scalar_lea.hbm %s2973_s6, 2048 }
  0x48   : > { %p2038_p6 = scmp.ne.s32.totalorder %s2973_s6, %s2037_s2  ;;  %p2044_p13 = scmp.lt.u32.totalorder %s2037_s2, %s2973_s6 }
  0x49   : > { %s3047_s26 = scalar_select %p2603_p5, 1, 0 }
  0x4a   : > { %p1835_p2 = pneg %p2603_p5 }
  0x4c   : > { %p2611_p8 = pnand %p1835_p2, %p2998_p10 }
  0x4e   : > { %p2039_p7 = pneg %p2611_p8 }
  0x50   : > { %p2040_p9 = pnand %p2039_p7, %p2038_p6 }
  0x52   : > { %p2041_p11 = pneg %p2040_p9 }
  0x54   : > { %p2046_p2 = pnand %p2044_p13, %p2041_p11 }
  0x56   : > { %2049 = shalt.err (!%p2046_p2)
}
  0x57   : > { %s2050_s9 = scalar_lea.vmem %s297_s8, 2048  ;;  %p2058_p0 = scmp.lt.s32.totalorder %s297_s8, %s297_s8 }
  0x58   : > { %p2051_p10 = scmp.ne.s32.totalorder %s297_s8, %s2050_s9  ;;  %p2059_p5 = scmp.lt.s32.totalorder %s2050_s9, %s2050_s9 }
  0x5a   : > { %p2053_p3 = pnand %p2051_p10, %p2039_p7  ;;  %p2060_p12 = por %p2059_p5, %p2058_p0 }
  0x5c   : > { %p2054_p1 = pneg %p2053_p3 }
  0x5e   : > { %p2061_p4 = pnand %p2060_p12, %p2054_p1 }
  0x60   : > { %2064 = shalt.err (!%p2061_p4)
}
  0x61   : > { %s2342_s27 = smov 128   ;;  %s2343_s28 = smov 8  }
  0x62   : > { %1838 = dma.hbm_to_vmem [thread:$0]  (!%p2611_p8), %s2973_s6, 2048, %s297_s8, [#allocation12], %s2342_s27, %s2342_s27, %s2343_s28  }
  0x63   : > { %p1480_p6 = scmp.ge.s32.totalorder %s2339_s22, 12 }
  0x64   : > { %p3049_p9 = scmp.ne.s32.totalorder (!%p1480_p6), %s3025_s4, 0 }
  0x65   : > { %309 = sbr.rel (%p1480_p6) target bundleno = 208 (0xd0), region = 24 }
  0x6c   : > { %312 = sbr.rel (!%p3049_p9) target bundleno = 124 (0x7c), region = 28  ;;  %s314_s9 = sand.u32 (%p3049_p9), 1, %s2311_s15  }
  0x6d   : > { %s1533_s18 = sshll.u32 (%p3049_p9), %s2335_s21, 4  ;;  %s1481_s12 = sshll.u32 (%p3049_p9), %s314_s9, 5 }
  0x6e   : > { %s319_s2 = sadd.s32 (%p3049_p9), %s2327_s19, %s1533_s18  ;;  %s1821_s23 = smul.u32 (%p3049_p9), 48, %s2331_s20 }
  0x6f   : > { %s3050_s0 = sld [smem:[#allocation40_spill]] (%p3049_p9)  ;;  %s316_s4 = scalar_lea.vmem (%p3049_p9), [#allocation4], %s1481_s12 }
  0x70   : > { %s321_s16 = sadd.s32 (%p3049_p9), %s1821_s23, %s319_s2 }
  0x71   : > { %s1484_s11 = sshll.u32 (%p3049_p9), %s321_s16, 2 }
  0x75   : > { %s323_s8 = scalar_lea.vmem %s3050_s0, %s1484_s11 }
  0x76   : > { %v339_v0 = vld [vmem:[%s323_s8] sm:$0xf]  ;;  %v341_v1 = vld [vmem:[%s323_s8 + $0x8] sm:$0xf]  ;;  %v343_v2 = vld [vmem:[%s323_s8 + $0x10] sm:$0xf] }
  0x77   : > { %340 = vst [vmem:[%s316_s4] sm:$0xf] %v339_v0  ;;  %342 = vst [vmem:[%s316_s4 + $0x4] sm:$0xf] %v341_v1  ;;  %v345_v3 = vld [vmem:[%s323_s8 + $0x18] sm:$0xf] }
  0x78   : > { %344 = vst [vmem:[%s316_s4 + $0x8] sm:$0xf] %v343_v2  ;;  %v347_v4 = vld [vmem:[%s323_s8 + $0x20] sm:$0xf]  ;;  %v349_v5 = vld [vmem:[%s323_s8 + $0x28] sm:$0xf] }
  0x79   : > { %346 = vst [vmem:[%s316_s4 + $0xc] sm:$0xf] %v345_v3  ;;  %348 = vst [vmem:[%s316_s4 + $0x10] sm:$0xf] %v347_v4  ;;  %v351_v6 = vld [vmem:[%s323_s8 + $0x30] sm:$0xf] }
  0x7a   : > { %350 = vst [vmem:[%s316_s4 + $0x14] sm:$0xf] %v349_v5  ;;  %v353_v7 = vld [vmem:[%s323_s8 + $0x38] sm:$0xf]  ;;  %352 = vst [vmem:[%s316_s4 + $0x18] sm:$0xf] %v351_v6 }
  0x7b   : > { %354 = vst [vmem:[%s316_s4 + $0x1c] sm:$0xf] %v353_v7 }
  0x7c PF: > { %s430_s14 = sand.u32 1, %s2339_s22   ;;  %s432_s23 = sand.u32 1, %s2291_s10  }
  0x7d   : > { %s1489_s11 = sshll.u32 %s432_s23, 7  ;;  %s1534_s27 = sshll.u32 %s2331_s20, 11 }
  0x7e   : > { %s3051_s3 = sld [smem:[#allocation42_spill]]  ;;  %s434_s18 = scalar_lea.vmem [#allocation8], %s1489_s11 }
  0x7f   : > { %s441_s2 = sshll.u32 %s434_s18, 4  ;;  %s394_s12 = sand.u32 1, %s2303_s13   ;;  %s2649_s2 = int_to_ptr.vmem [resolvable:$true] %s441_s2 }
  0x80   : > { %s2652_s16 = scalar_lea.sflag [#allocation9], %s430_s14  ;;  %p3052_p10 = scmp.ne.s32.totalorder %s3035_s7, 0 }
  0x84   : > { %s2647_s9 = scalar_lea.hbm %s3051_s3, %s1534_s27  ;;  %s2069_s23 = scalar_lea.hbm %s3051_s3, 4096 }
  0x85   : > { %s2065_s17 = scalar_lea.hbm %s2647_s9, 2048  ;;  %p2070_p0 = scmp.lt.u32.totalorder %s2647_s9, %s3051_s3 }
  0x86   : > { %p2066_p4 = scmp.ne.s32.totalorder %s2647_s9, %s2065_s17  ;;  %p2071_p1 = scmp.lt.u32.totalorder %s2069_s23, %s2065_s17 }
  0x87   : > { %p2073_p8 = scmp.lt.u32.totalorder %s2065_s17, %s2647_s9 }
  0x88   : > { %p2067_p12 = pnand %p2066_p4, %p3052_p10  ;;  %p2072_p3 = por %p2071_p1, %p2070_p0 }
  0x8a   : > { %p2068_p5 = pneg %p2067_p12  ;;  %p2074_p7 = por %p2073_p8, %p2072_p3 }
  0x8c   : > { %p2075_p11 = pnand %p2074_p7, %p2068_p5 }
  0x8e   : > { %2078 = shalt.err (!%p2075_p11)
}
  0x8f   : > { %s2079_s14 = scalar_lea.vmem %s2649_s2, 2048  ;;  %s2344_s11 = smov [#allocation8]  }
  0x90   : > { %p2080_p13 = scmp.ne.s32.totalorder %s2649_s2, %s2079_s14  ;;  %s2083_s24 = sshll.u32 %s2344_s11, 4  ;;  %s2084_s24 = int_to_ptr.vmem [resolvable:$false] %s2083_s24 }
  0x91   : > { %s2085_s18 = scalar_lea.vmem %s2084_s24, 4096  ;;  %p2086_p9 = scmp.lt.s32.totalorder %s2649_s2, %s2084_s24 }
  0x92   : > { %p2081_p2 = pnand %p2080_p13, %p3052_p10  ;;  %p2087_p4 = scmp.lt.s32.totalorder %s2085_s18, %s2079_s14 }
  0x94   : > { %p2082_p6 = pneg %p2081_p2  ;;  %p2088_p12 = por %p2087_p4, %p2086_p9 }
  0x96   : > { %p2089_p0 = pnand %p2088_p12, %p2082_p6 }
  0x98   : > { %2092 = shalt.err (!%p2089_p0)
}
  0x99   : > { %s2345_s17 = smov 128   ;;  %s2346_s8 = smov 8  }
  0x9a   : > { %1826 = dma.hbm_to_vmem [thread:$0]  (%p3052_p10), %s2647_s9, 2048, %s2649_s2, %s2652_s16, %s2345_s17, %s2345_s17, %s2346_s8  }
  0x9b   : > { %s1485_s4 = sshll.u32 %s394_s12, 6  ;;  %s1486_s23 = sshll.u32 %s2327_s19, 4 }
  0x9c   : > { %s1487_s27 = sshll.u32 %s2331_s20, 5  ;;  %s398_s28 = scalar_lea.vmem [#allocation5], %s1485_s4 }
  0x9d   : > { %s407_s14 = sshll.u32 %s398_s28, 4  ;;  %s404_s11 = sadd.s32 %s1487_s27, %s1486_s23  ;;  %s2683_s14 = int_to_ptr.vmem [resolvable:$true] %s407_s14 }
  0x9e   : > { %s1488_s24 = sshll.u32 %s404_s11, 6  ;;  %s2692_s7 = scalar_lea.sflag [#allocation6], %s394_s12 }
  0x9f   : > { %s2688_s3 = scalar_lea.hbm %s2968_s1, %s1488_s24  ;;  %p3053_p5 = scmp.ne.s32.totalorder %s3027_s25, 0 }
  0xa0   : > { %s2093_s9 = scalar_lea.hbm %s2688_s3, 1024  ;;  %s2097_s23 = scalar_lea.hbm %s2968_s1, 4096 }
  0xa1   : > { %p2094_p10 = scmp.ne.s32.totalorder %s2688_s3, %s2093_s9  ;;  %p2098_p8 = scmp.lt.u32.totalorder %s2688_s3, %s2968_s1 }
  0xa2   : > { %p2099_p7 = scmp.lt.u32.totalorder %s2097_s23, %s2093_s9  ;;  %p2101_p13 = scmp.lt.u32.totalorder %s2093_s9, %s2688_s3 }
  0xa3   : > { %p2095_p1 = pnand %p2094_p10, %p3053_p5 }
  0xa4   : > { %p2100_p11 = por %p2099_p7, %p2098_p8 }
  0xa5   : > { %p2096_p3 = pneg %p2095_p1 }
  0xa6   : > { %p2102_p2 = por %p2101_p13, %p2100_p11 }
  0xa8   : > { %p2103_p6 = pnand %p2102_p2, %p2096_p3 }
  0xaa   : > { %2106 = shalt.err (!%p2103_p6)
}
  0xab   : > { %s2107_s12 = scalar_lea.vmem %s2683_s14, 1024  ;;  %s2347_s28 = smov [#allocation5]  }
  0xac   : > { %p2108_p9 = scmp.ne.s32.totalorder %s2683_s14, %s2107_s12  ;;  %s2111_s11 = sshll.u32 %s2347_s28, 4  ;;  %s2112_s11 = int_to_ptr.vmem [resolvable:$false] %s2111_s11 }
  0xad   : > { %s2113_s24 = scalar_lea.vmem %s2112_s11, 2048  ;;  %p2114_p0 = scmp.lt.s32.totalorder %s2683_s14, %s2112_s11 }
  0xae   : > { %p2109_p4 = pnand %p2108_p9, %p3053_p5  ;;  %p2115_p10 = scmp.lt.s32.totalorder %s2113_s24, %s2107_s12 }
  0xb0   : > { %p2110_p12 = pneg %p2109_p4  ;;  %p2116_p1 = por %p2115_p10, %p2114_p0 }
  0xb2   : > { %p2117_p8 = pnand %p2116_p1, %p2110_p12 }
  0xb4   : > { %2120 = shalt.err (!%p2117_p8)
}
  0xb5   : > { %s2348_s18 = smov 64   ;;  %s2349_s9 = smov 4  }
  0xb6   : > { %1825 = dma.hbm_to_vmem [thread:$0]  (%p3053_p5), %s2688_s3, 1024, %s2683_s14, %s2692_s7, %s2348_s18, %s2348_s18, %s2349_s9  }
  0xb7   : > { %s459_s2 = sand.u32 1, %s2279_s29   ;;  %s1535_s4 = sshll.u32 %s2335_s21, 10 }
  0xb8   : > { %s1492_s23 = sshll.u32 %s459_s2, 6  ;;  %s2721_s12 = scalar_lea.hbm %s2972_s5, %s1535_s4 }
  0xb9   : > { %s461_s28 = scalar_lea.vmem [#allocation10], %s1492_s23  ;;  %s2121_s24 = scalar_lea.hbm %s2721_s12, 1024 }
  0xba   : > { %s468_s11 = sshll.u32 %s461_s28, 4  ;;  %p2122_p3 = scmp.ne.s32.totalorder %s2721_s12, %s2121_s24  ;;  %s2723_s11 = int_to_ptr.vmem [resolvable:$true] %s468_s11 }
  0xbb   : > { %p3054_p7 = scmp.ne.s32.totalorder %s3040_s30, 0  ;;  %s2125_s14 = scalar_lea.hbm %s2972_s5, 3072 }
  0xbc   : > { %p2126_p13 = scmp.lt.u32.totalorder %s2721_s12, %s2972_s5  ;;  %p2127_p2 = scmp.lt.u32.totalorder %s2125_s14, %s2121_s24 }
  0xbd   : > { %p2123_p5 = pnand %p2122_p3, %p3054_p7  ;;  %p2129_p9 = scmp.lt.u32.totalorder %s2121_s24, %s2721_s12 }
  0xbe   : > { %p2128_p6 = por %p2127_p2, %p2126_p13 }
  0xbf   : > { %p2124_p11 = pneg %p2123_p5 }
  0xc0   : > { %p2130_p4 = por %p2129_p9, %p2128_p6 }
  0xc2   : > { %p2131_p12 = pnand %p2130_p4, %p2124_p11 }
  0xc4   : > { %2134 = shalt.err (!%p2131_p12)
}
  0xc5   : > { %s2135_s9 = scalar_lea.vmem %s2723_s11, 1024  ;;  %s2350_s2 = smov [#allocation10]  }
  0xc6   : > { %p2136_p0 = scmp.ne.s32.totalorder %s2723_s11, %s2135_s9  ;;  %s2139_s4 = sshll.u32 %s2350_s2, 4  ;;  %s2140_s4 = int_to_ptr.vmem [resolvable:$false] %s2139_s4 }
  0xc7   : > { %s2141_s23 = scalar_lea.vmem %s2140_s4, 2048  ;;  %p2142_p8 = scmp.lt.s32.totalorder %s2723_s11, %s2140_s4 }
  0xc8   : > { %p2137_p10 = pnand %p2136_p0, %p3054_p7  ;;  %p2143_p3 = scmp.lt.s32.totalorder %s2141_s23, %s2135_s9 }
  0xca   : > { %p2138_p1 = pneg %p2137_p10  ;;  %p2144_p5 = por %p2143_p3, %p2142_p8 }
  0xcc   : > { %p2145_p13 = pnand %p2144_p5, %p2138_p1 }
  0xce   : > { %2148 = shalt.err (!%p2145_p13)
}
  0xcf   : > { %1827 = dma.hbm_to_vmem [thread:$0]  (%p3054_p7), %s2721_s12, 1024, %s2723_s11, %s2652_s16, %s2345_s17, %s2345_s17, %s2346_s8  }
  0xd0 PF: > { %p3055_p11 = scmp.ne.s32.totalorder %s3047_s26, 0 }
  0xd1   : > { %s3056_s27 = sld [smem:[#allocation23_spill]] (!%p3055_p11)  ;;  %s3057_s0 = sld [smem:[#allocation22_spill]] (!%p3055_p11) }
  0xd2   : > { %480 = sbr.rel (%p3055_p11) target bundleno = 1058 (0x422), region = 89  ;;  %s3058_s28 = sld [smem:[#allocation32_spill]] (!%p3055_p11) }
  0xd7   : > { %s483_s24 = sand.u32 (!%p3055_p11), 1, %s3056_s27   ;;  %s489_s3 = sand.u32 (!%p3055_p11), 1, %s3057_s0  }
  0xd8   : > { %s1496_s25 = sshll.u32 (!%p3055_p11), %s483_s24, 5  ;;  %s1497_s14 = sshll.u32 (!%p3055_p11), %s489_s3, 6 }
  0xd9   : > { %s2754_s7 = scalar_lea.vmem [#allocation4], %s1496_s25  ;;  %s490_s30 = scalar_lea.sflag [#allocation6], %s489_s3 }
  0xda   : > { %s2756_s18 = scalar_lea.vmem [#allocation5], %s1497_s14  ;;  %p3059_p2 = scmp.ne.s32.totalorder %s3058_s28, 0 }
  0xdc   : > { %2250 = dma.done.wait (%p3059_p2), %s490_s30, 1024  }
  0xdd   : > { %2252 = vsyncadd (%p3059_p2), %s490_s30, 4294966272  ;;  %s3060_s16 = sld [smem:[#allocation27_spill]]  ;;  %s3061_s26 = sld [smem:[#allocation21_spill]] }
  0xde   : > { %s3062_s17 = sld [smem:[#allocation35_spill]] }
  0xe3   : > { %s498_s8 = sand.u32 1, %s3060_s16   ;;  %s500_s12 = sand.u32 1, %s3061_s26  }
  0xe4   : > { %s1498_s11 = sshll.u32 %s500_s12, 7  ;;  %s499_s9 = scalar_lea.sflag [#allocation9], %s498_s8 }
  0xe5   : > { %s2764_s2 = scalar_lea.vmem [#allocation8], %s1498_s11  ;;  %p3063_p7 = scmp.ne.s32.totalorder %s3062_s17, 0 }
  0xe7   : > { %2254 = dma.done.wait (%p3063_p7), %s499_s9, 2048  }
  0xe8   : > { %2256 = vsyncadd (%p3063_p7), %s499_s9, 4294965248  ;;  %s3064_s4 = sld [smem:[#allocation20_spill]]  ;;  %s3065_s23 = sld [smem:[#allocation37_spill]] }
  0xee   : > { %s3008_s27 = sand.u32 1, %s3064_s4   ;;  %p3066_p6 = scmp.ne.s32.totalorder %s3065_s23, 0 }
  0xef   : > { %s1499_s0 = sshll.u32 %s3008_s27, 6 }
  0xf0   : > { %s2773_s28 = scalar_lea.vmem [#allocation10], %s1499_s0 }
  0xf1   : > { %2258 = dma.done.wait (%p3066_p6), %s499_s9, 1024  }
  0xf2   : > { %2260 = vsyncadd (%p3066_p6), %s499_s9, 4294966272  ;;  %p3067_p9 = scmp.eq.s32.totalorder %s3060_s16, 0 }
  0xf4   : > { %2262 = dma.done.wait (%p3067_p9), [#allocation12], 2048   ;;  %p3068_p4 = pmov %p3067_p9 }
  0xf5   : > { %s3069_s24 = sld [smem:[#allocation26_spill]]  ;;  %s3070_s3 = sld [smem:[#allocation25_spill]] }
  0xf6   : > { %2264 = vsyncadd (%p3068_p4), [#allocation12], 4294965248  ;;  %s3071_s25 = sld [smem:[#allocation24_spill]]  ;;  %s3072_s16 = sld [smem:[#allocation43_spill]] }
  0xf7   : > { %s3073_s23 = sld [smem:[#allocation41_spill]]  ;;  %s2800_s27 = scalar_lea.vmem [#allocation13], %s1499_s0 }
  0xfb   : > { %s1502_s14 = sshll.u32 %s3069_s24, 3  ;;  %p577_p12 = scmp.lt.s32.totalorder %s3070_s3, 1 }
  0xfc   : > { %p579_p0 = scmp.lt.s32.totalorder %s1502_s14, 23  ;;  %p592_p10 = scmp.eq.s32.totalorder %s3070_s3, 0 }
  0xfd   : > { %p593_p1 = scmp.eq.s32.totalorder %s3071_s25, 0  ;;  %s3126_s3 = smov (!%p577_p12, %s3070_s3), 1 }
  0xfe   : > { %s3128_s14 = smov (!%p579_p0, %s1502_s14), 23  ;;  %s1822_s30 = smul.u32 24, %s3126_s3 }
  0xff   : > { %s588_s8 = scalar_lea.vmem %s3072_s16, %s3126_s3  ;;  %p594_p8 = pnand %p593_p1, %p592_p10 }
 0x100   : > { %s582_s12 = sadd.s32 %s1822_s30, %s3128_s14  ;;  %v2351_v8 = vmov (!%p594_p8), 0.0  }
 0x101   : > { %s1503_s11 = sshll.u32 %s582_s12, 3  ;;  %597 = sbr.rel (%p594_p8) target bundleno = 264 (0x108), region = 113  ;;  %598 = vst [vmem:[#allocation3] sm:$0xff] (!%p594_p8), %v2351_v8  ;;  %599 = vst [vmem:[#allocation3 + $0x8] sm:$0xff] (!%p594_p8), %v2351_v8 }
 0x102   : > { %s2798_s24 = scalar_lea.vmem %s3073_s23, %s1503_s11  ;;  %600 = vst [vmem:[#allocation3 + $0x10] sm:$0xff] (!%p594_p8), %v2351_v8  ;;  %601 = vst [vmem:[#allocation3 + $0x18] sm:$0xff] (!%p594_p8), %v2351_v8 }
 0x103   : > { %602 = vst [vmem:[#allocation3 + $0x20] sm:$0xff] (!%p594_p8), %v2351_v8  ;;  %603 = vst [vmem:[#allocation3 + $0x28] sm:$0xff] (!%p594_p8), %v2351_v8 }
 0x104   : > { %604 = vst [vmem:[#allocation3 + $0x30] sm:$0xff] (!%p594_p8), %v2351_v8  ;;  %605 = vst [vmem:[#allocation3 + $0x38] sm:$0xff] (!%p594_p8), %v2351_v8 }
 0x108 PF: > { %s3074_s25 = sld [smem:[#allocation24_spill]] }
 0x10e   : > { %p1504_p3 = scmp.ne.s32.totalorder %s3074_s25, 0 }
 0x10f   : > { %v2352_v9 = vmov (!%p1504_p3), 0.0  }
 0x110   : > { %608 = sbr.rel (%p1504_p3) target bundleno = 279 (0x117), region = 117  ;;  %609 = vst [vmem:[#allocation2] sm:$0xff] (!%p1504_p3), %v2352_v9  ;;  %610 = vst [vmem:[#allocation2 + $0x8] sm:$0xff] (!%p1504_p3), %v2352_v9 }
 0x111   : > { %611 = vst [vmem:[#allocation2 + $0x10] sm:$0xff] (!%p1504_p3), %v2352_v9  ;;  %612 = vst [vmem:[#allocation2 + $0x18] sm:$0xff] (!%p1504_p3), %v2352_v9 }
 0x112   : > { %613 = vst [vmem:[#allocation2 + $0x20] sm:$0xff] (!%p1504_p3), %v2352_v9  ;;  %614 = vst [vmem:[#allocation2 + $0x28] sm:$0xff] (!%p1504_p3), %v2352_v9 }
 0x113   : > { %615 = vst [vmem:[#allocation2 + $0x30] sm:$0xff] (!%p1504_p3), %v2352_v9  ;;  %616 = vst [vmem:[#allocation2 + $0x38] sm:$0xff] (!%p1504_p3), %v2352_v9 }
 0x117 PF: > { %v2003_v10 = vld [vmem:[%s2756_s18] sm:$0xff]   ;;  %v2004_v11 = vld [vmem:[%s2756_s18 + $0x8] sm:$0xff]   ;;  %v2005_v12 = vld [vmem:[%s2756_s18 + $0x10] sm:$0xff]   ;;  %s3075_s0 = sld [smem:[#allocation24_spill]] }
 0x118   : > { %1597 = vmatprep.subr.bf16.mxu0 %v2003_v10  ;;  %1773 = vmatprep.subr.bf16.mxu1 %v2003_v10  ;;  %v2006_v13 = vld [vmem:[%s2756_s18 + $0x18] sm:$0xff]   ;;  %v2011_v14 = vld [vmem:[%s2754_s7] sm:$0xff]   ;;  %v2012_v15 = vld [vmem:[%s2754_s7 + $0x10] sm:$0xff]  }
 0x119   : > { %1598 = vmatpush3.bf16.msra.mxu0 %v2003_v10  ;;  %1781 = vmatpush3.bf16.msra.mxu1 %v2003_v10  ;;  %v2007_v16 = vld [vmem:[%s2756_s18 + $0x20] sm:$0xff]   ;;  %v2008_v17 = vld [vmem:[%s2756_s18 + $0x28] sm:$0xff]   ;;  %v2009_v18 = vld [vmem:[%s2756_s18 + $0x30] sm:$0xff]  }
 0x11a   : > { %1599 = vmatprep.subr.bf16.mxu0 %v2004_v11  ;;  %1774 = vmatprep.subr.bf16.mxu1 %v2004_v11  ;;  %v2010_v19 = vld [vmem:[%s2756_s18 + $0x38] sm:$0xff]   ;;  %v2013_v20 = vld [vmem:[%s2754_s7 + $0x8] sm:$0xff]   ;;  %v619_v22 = vld [vmem:[#allocation2 + $0x10] sm:$0xff] }
 0x11b   : > { %1613 = vmatprep.mubr.bf16.mxu0 %v2011_v14  ;;  %1617 = vmatprep.mubr.bf16.mxu1 %v2012_v15  ;;  %v2014_v21 = vld [vmem:[%s2754_s7 + $0x18] sm:$0xff]   ;;  %v623_v23 = vld [vmem:[#allocation2 + $0x30] sm:$0xff]  ;;  %v617_v24 = vld [vmem:[#allocation2] sm:$0xff] }
 0x11c   : > { %v621_v25 = vld [vmem:[#allocation2 + $0x20] sm:$0xff]  ;;  %v620_v28 = vld [vmem:[#allocation2 + $0x18] sm:$0xff]  ;;  %v618_v34 = vld [vmem:[#allocation2 + $0x8] sm:$0xff] }
 0x11d   : > { %1600 = vmatpush3.bf16.msra.mxu0 %v2004_v11  ;;  %1782 = vmatpush3.bf16.msra.mxu1 %v2004_v11  ;;  %p802_p5 = scmp.eq.s32.totalorder %s3075_s0, 1  ;;  %v624_v29 = vld [vmem:[#allocation2 + $0x38] sm:$0xff]  ;;  %v622_v35 = vld [vmem:[#allocation2 + $0x28] sm:$0xff]  ;;  %p1517_p13 = scmp.ne.s32.totalorder %s3075_s0, 1 }
 0x11e   : > { %1601 = vmatprep.subr.bf16.mxu0 %v2005_v12  ;;  %1775 = vmatprep.subr.bf16.mxu1 %v2005_v12  ;;  %v807_v46 = vld [vmem:[%s2798_s24 + $0x8] sm:$0xff] (!%p1517_p13)  ;;  %v806_v47 = vld [vmem:[%s2798_s24] sm:$0xff] (!%p1517_p13)  ;;  %v2353_v48 = vmov (!%p1517_p13), 0   ;;  %v904_v53 = vld [vmem:[%s2764_s2 + $0x10] sm:$0xff] (!%p1517_p13)  ;;  %v2354_v1 = vmov (!%p1517_p13), 0.0  }
 0x11f   : > { %2016 = vset.pattern.permute.xlu1 (!%p1517_p13), %v2353_v48  ;;  %2015 = vset.pattern.permute.xlu0 (!%p1517_p13), %v2353_v48  ;;  %v811_v49 = vld [vmem:[%s2798_s24 + $0x28] sm:$0xff] (!%p1517_p13)  ;;  %v810_v50 = vld [vmem:[%s2798_s24 + $0x20] sm:$0xff] (!%p1517_p13)  ;;  %v905_v54 = vld [vmem:[%s2764_s2 + $0x18] sm:$0xff] (!%p1517_p13)  ;;  %vm871_vm0 = vcmp.gt.f32.partialorder (!%p1517_p13), %v807_v46, 0.0  ;;  %vm870_vm1 = vcmp.gt.f32.partialorder (!%p1517_p13), %v806_v47, 0.0 }
 0x120   : > { %829 = vperm.xlu1 (!%p1517_p13), %2016, %v807_v46   ;;  %824 = vperm.xlu0 (!%p1517_p13), %2015, %v806_v47   ;;  %v902_v51 = vld [vmem:[%s2764_s2] sm:$0xff] (!%p1517_p13)  ;;  %v903_v52 = vld [vmem:[%s2764_s2 + $0x8] sm:$0xff] (!%p1517_p13)  ;;  %v809_v55 = vld [vmem:[%s2798_s24 + $0x18] sm:$0xff] (!%p1517_p13)  ;;  %v1713_v57 = vpack.c.bf16 (!%p1517_p13), %v905_v54, %v904_v53  ;;  %v1519_v2 = vsel (!%p1517_p13), %vm871_vm0, 1.0, %v2354_v1  ;;  %v1518_v3 = vsel (!%p1517_p13), %vm870_vm1, 1.0, %v2354_v1  ;;  %vm875_vm4 = vcmp.gt.f32.partialorder (!%p1517_p13), %v811_v49, 0.0 }
 0x121   : > { %1602 = vmatpush3.bf16.msra.mxu0 %v2005_v12  ;;  %1783 = vmatpush3.bf16.msra.mxu1 %v2005_v12  ;;  %v1709_v56 = vpack.c.bf16 (!%p1517_p13), %v903_v52, %v902_v51  ;;  %v906_v58 = vld [vmem:[%s2764_s2 + $0x20] sm:$0xff] (!%p1517_p13)  ;;  %v907_v59 = vld [vmem:[%s2764_s2 + $0x28] sm:$0xff] (!%p1517_p13)  ;;  %v812_v60 = vld [vmem:[%s2798_s24 + $0x30] sm:$0xff] (!%p1517_p13)  ;;  %vm873_vm3 = vcmp.gt.f32.partialorder (!%p1517_p13), %v809_v55, 0.0  ;;  %vm874_vm5 = vcmp.gt.f32.partialorder (!%p1517_p13), %v810_v50, 0.0  ;;  %v2017_v8 = vpack.i.bf16 (!%p1517_p13), %v1519_v2, %v1518_v3 }
 0x122   : > { %1603 = vmatprep.subr.bf16.mxu0 %v2006_v13  ;;  %1776 = vmatprep.subr.bf16.mxu1 %v2006_v13  ;;  %v808_v61 = vld [vmem:[%s2798_s24 + $0x10] sm:$0xff] (!%p1517_p13)  ;;  %v1717_v62 = vpack.c.bf16 (!%p1517_p13), %v907_v59, %v906_v58  ;;  %v909_v0 = vld [vmem:[%s2764_s2 + $0x38] sm:$0xff] (!%p1517_p13)  ;;  %v1521_v6 = vsel (!%p1517_p13), %vm873_vm3, 1.0, %v2354_v1  ;;  %vm876_vm6 = vcmp.gt.f32.partialorder (!%p1517_p13), %v812_v60, 0.0  ;;  %v910_v10 = vld [vmem:[%s2764_s2 + $0x40] sm:$0xff] (!%p1517_p13)  ;;  %v1523_v12 = vsel (!%p1517_p13), %vm875_vm4, 1.0, %v2354_v1 }
 0x123   : > { %vm872_vm2 = vcmp.gt.f32.partialorder (!%p1517_p13), %v808_v61, 0.0  ;;  %v908_v63 = vld [vmem:[%s2764_s2 + $0x30] sm:$0xff] (!%p1517_p13)  ;;  %v813_v5 = vld [vmem:[%s2798_s24 + $0x38] sm:$0xff] (!%p1517_p13)  ;;  %v911_v11 = vld [vmem:[%s2764_s2 + $0x48] sm:$0xff] (!%p1517_p13)  ;;  %v1524_v14 = vsel (!%p1517_p13), %vm876_vm6, 1.0, %v2354_v1 }
 0x124   : > { %849 = vperm.xlu1 (!%p1517_p13), %2016, %v811_v49   ;;  %844 = vperm.xlu0 (!%p1517_p13), %2015, %v810_v50   ;;  %v1520_v4 = vsel (!%p1517_p13), %vm872_vm2, 1.0, %v2354_v1  ;;  %vm877_vm7 = vcmp.gt.f32.partialorder (!%p1517_p13), %v813_v5, 0.0  ;;  %v1721_v7 = vpack.c.bf16 (!%p1517_p13), %v909_v0, %v908_v63 }
 0x125   : > { %1604 = vmatpush3.bf16.msra.mxu0 %v2006_v13  ;;  %1784 = vmatpush3.bf16.msra.mxu1 %v2006_v13  ;;  %v2022_v9 = vpack.i.bf16 (!%p1517_p13), %v1521_v6, %v1520_v4  ;;  %v1522_v13 = vsel (!%p1517_p13), %vm874_vm5, 1.0, %v2354_v1  ;;  %v1525_v15 = vsel (!%p1517_p13), %vm877_vm7, 1.0, %v2354_v1  ;;  %v894_v1 = vld [vmem:[#allocation3] sm:$0xff] (!%p1517_p13) }
 0x126   : > { %1605 = vmatprep.subr.bf16.mxu0 %v2007_v16  ;;  %1777 = vmatprep.subr.bf16.mxu1 %v2007_v16 }
 0x128   : > { %854 = vperm.xlu1 (!%p1517_p13), %2016, %v812_v60   ;;  %834 = vperm.xlu0 (!%p1517_p13), %2015, %v808_v61   ;;  %v895_v61 = vld [vmem:[#allocation3 + $0x8] sm:$0xff] (!%p1517_p13) }
 0x129   : > { %1606 = vmatpush3.bf16.msra.mxu0 %v2007_v16  ;;  %1785 = vmatpush3.bf16.msra.mxu1 %v2007_v16  ;;  %v1725_v16 = vpack.c.bf16 (!%p1517_p13), %v911_v11, %v910_v10 }
 0x12a   : > { %1607 = vmatprep.subr.bf16.mxu0 %v2008_v17  ;;  %1778 = vmatprep.subr.bf16.mxu1 %v2008_v17 }
 0x12c   : > { %859 = vperm.xlu1 (!%p1517_p13), %2016, %v813_v5   ;;  %839 = vperm.xlu0 (!%p1517_p13), %2015, %v809_v55  }
 0x12d   : > { %1608 = vmatpush3.bf16.msra.mxu0 %v2008_v17  ;;  %1786 = vmatpush3.bf16.msra.mxu1 %v2008_v17  ;;  %v2032_v17 = vpack.i.bf16 (!%p1517_p13), %v1525_v15, %v1524_v14 }
 0x12e   : > { %1609 = vmatprep.subr.bf16.mxu0 %v2009_v18  ;;  %1779 = vmatprep.subr.bf16.mxu1 %v2009_v18 }
 0x130   : > { %2023 = vperm.xlu1 (!%p1517_p13), %2016, %v2022_v9   ;;  %2018 = vperm.xlu0 (!%p1517_p13), %2015, %v2017_v8   ;;  %v899_v8 = vld [vmem:[#allocation3 + $0x28] sm:$0xff] (!%p1517_p13) }
 0x131   : > { %1610 = vmatpush3.bf16.msra.mxu0 %v2009_v18  ;;  %1787 = vmatpush3.bf16.msra.mxu1 %v2009_v18  ;;  %v2027_v18 = vpack.i.bf16 (!%p1517_p13), %v1523_v12, %v1522_v13  ;;  %v898_v12 = vld [vmem:[#allocation3 + $0x20] sm:$0xff] (!%p1517_p13) }
 0x132   : > { %1611 = vmatprep.subr.bf16.mxu0 %v2010_v19  ;;  %1780 = vmatprep.subr.bf16.mxu1 %v2010_v19 }
 0x134   : > { %2033 = vperm.xlu1 (!%p1517_p13), %2016, %v2032_v17   ;;  %2028 = vperm.xlu0 (!%p1517_p13), %2015, %v2027_v18  }
 0x135   : > { %1612 = vmatpush3.bf16.msra.mxu0 %v2010_v19  ;;  %1788 = vmatpush3.bf16.msra.mxu1 %v2010_v19  ;;  %v912_v19 = vld [vmem:[%s2764_s2 + $0x50] sm:$0xff] (!%p1517_p13) }
 0x136   : > { %1710 = vmatprep.subr.bf16.mxu0 (!%p1517_p13), %v1709_v56  ;;  %1789 = vmatprep.subr.bf16.mxu1 (!%p1517_p13), %v1709_v56 }
 0x138   : > { %1614 = vmatmul.mubr.bf16.vlgmr.msra.gmra.mrb[0].mxu0 %v2013_v20  ;;  %1618 = vmatmul.mubr.bf16.vlgmr.msra.gmra.mrb[0].mxu1 %v2014_v21  ;;  %v913_v20 = vld [vmem:[%s2764_s2 + $0x58] sm:$0xff] (!%p1517_p13) }
 0x139   : > { %1712 = vmatpush3.bf16.msra.mxu0 (!%p1517_p13), %v1709_v56  ;;  %1797 = vmatpush3.bf16.msra.mxu1 (!%p1517_p13), %v1709_v56  ;;  %v1729_v21 = vpack.c.bf16 (!%p1517_p13), %v913_v20, %v912_v19  ;;  %v1526_v56 = vld [vmem:[%s588_s8] ss:$0 sm:$0xff] (!%p1517_p13) }
 0x13a   : > { %1714 = vmatprep.subr.bf16.mxu0 (!%p1517_p13), %v1713_v57  ;;  %1790 = vmatprep.subr.bf16.mxu1 (!%p1517_p13), %v1713_v57 }
 0x13d   : > { %1716 = vmatpush3.bf16.msra.mxu0 (!%p1517_p13), %v1713_v57  ;;  %1798 = vmatpush3.bf16.msra.mxu1 (!%p1517_p13), %v1713_v57 }
 0x13e   : > { %1718 = vmatprep.subr.bf16.mxu0 (!%p1517_p13), %v1717_v62  ;;  %1791 = vmatprep.subr.bf16.mxu1 (!%p1517_p13), %v1717_v62 }
 0x141   : > { %1720 = vmatpush3.bf16.msra.mxu0 (!%p1517_p13), %v1717_v62  ;;  %1799 = vmatpush3.bf16.msra.mxu1 (!%p1517_p13), %v1717_v62 }
 0x142   : > { %1722 = vmatprep.subr.bf16.mxu0 (!%p1517_p13), %v1721_v7  ;;  %1792 = vmatprep.subr.bf16.mxu1 (!%p1517_p13), %v1721_v7 }
 0x145   : > { %1724 = vmatpush3.bf16.msra.mxu0 (!%p1517_p13), %v1721_v7  ;;  %1800 = vmatpush3.bf16.msra.mxu1 (!%p1517_p13), %v1721_v7 }
 0x146   : > { %1726 = vmatprep.subr.bf16.mxu0 (!%p1517_p13), %v1725_v16  ;;  %1793 = vmatprep.subr.bf16.mxu1 (!%p1517_p13), %v1725_v16 }
 0x149   : > { %1728 = vmatpush3.bf16.msra.mxu0 (!%p1517_p13), %v1725_v16  ;;  %1801 = vmatpush3.bf16.msra.mxu1 (!%p1517_p13), %v1725_v16 }
 0x14a   : > { %1730 = vmatprep.subr.bf16.mxu0 (!%p1517_p13), %v1729_v21  ;;  %1794 = vmatprep.subr.bf16.mxu1 (!%p1517_p13), %v1729_v21 }
 0x14d   : > { %1732 = vmatpush3.bf16.msra.mxu0 (!%p1517_p13), %v1729_v21  ;;  %1802 = vmatpush3.bf16.msra.mxu1 (!%p1517_p13), %v1729_v21 }
 0x20b   : > { %v1615_v26 = vpop.f32.mrb[0].mxu0  ;;  %v1619_v27 = vpop.f32.mrb[0].mxu1  ;;  %805 = sbr.rel (%p1517_p13) target bundleno = 762 (0x2fa), region = 121 }
 0x20c   : > { %v788_v30 = vadd.f32 %v1615_v26, %v619_v22  ;;  %v792_v31 = vadd.f32 %v1619_v27, %v623_v23  ;;  %v755_v32 = vpop.f32.mrb[1].mxu0  ;;  %v771_v33 = vpop.f32.mrb[1].mxu1  ;;  %v914_v22 = vld [vmem:[%s2764_s2 + $0x60] sm:$0xff] (!%p1517_p13)  ;;  %v915_v23 = vld [vmem:[%s2764_s2 + $0x68] sm:$0xff] (!%p1517_p13)  ;;  %v917_v26 = vld [vmem:[%s2764_s2 + $0x78] sm:$0xff] (!%p1517_p13) }
 0x20d   : > { %v786_v36 = vadd.f32 %v755_v32, %v617_v24  ;;  %v790_v37 = vadd.f32 %v771_v33, %v621_v25  ;;  %v1616_v38 = vpop.f32.mrb[2].mxu0  ;;  %v1620_v39 = vpop.f32.mrb[2].mxu1  ;;  %v1733_v24 = vpack.c.bf16 (!%p1517_p13), %v915_v23, %v914_v22  ;;  %v916_v25 = vld [vmem:[%s2764_s2 + $0x70] sm:$0xff] (!%p1517_p13)  ;;  %v897_v23 = vld [vmem:[#allocation3 + $0x18] sm:$0xff] (!%p1517_p13) }
 0x20e   : > { %796 = vst [vmem:[#allocation2 + $0x10] sm:$0xff] %v788_v30  ;;  %800 = vst [vmem:[#allocation2 + $0x30] sm:$0xff] %v792_v31  ;;  %v789_v40 = vadd.f32 %v1616_v38, %v620_v28  ;;  %v793_v41 = vadd.f32 %v1620_v39, %v624_v29  ;;  %v758_v42 = vpop.f32.mrb[3].mxu0  ;;  %v774_v43 = vpop.f32.mrb[3].mxu1  ;;  %v1737_v27 = vpack.c.bf16 (!%p1517_p13), %v917_v26, %v916_v25  ;;  %v901_v25 = vld [vmem:[#allocation3 + $0x38] sm:$0xff] (!%p1517_p13) }
 0x20f   : > { %794 = vst [vmem:[#allocation2] sm:$0xff] %v786_v36  ;;  %798 = vst [vmem:[#allocation2 + $0x20] sm:$0xff] %v790_v37  ;;  %v787_v44 = vadd.f32 %v758_v42, %v618_v34  ;;  %v791_v45 = vadd.f32 %v774_v43, %v622_v35  ;;  %1734 = vmatprep.subr.bf16.mxu0 (!%p1517_p13), %v1733_v24  ;;  %1795 = vmatprep.subr.bf16.mxu1 (!%p1517_p13), %v1733_v24  ;;  %v830_v30 = vpop.permute.xlu1 (!%p1517_p13), %829  ;;  %v825_v31 = vpop.permute.xlu0 (!%p1517_p13), %824 }
 0x210   : > { %797 = vst [vmem:[#allocation2 + $0x18] sm:$0xff] %v789_v40  ;;  %801 = vst [vmem:[#allocation2 + $0x38] sm:$0xff] %v793_v41  ;;  %1736 = vmatpush3.bf16.msra.mxu0 (!%p1517_p13), %v1733_v24  ;;  %1803 = vmatpush3.bf16.msra.mxu1 (!%p1517_p13), %v1733_v24 }
 0x211   : > { %795 = vst [vmem:[#allocation2 + $0x8] sm:$0xff] %v787_v44  ;;  %799 = vst [vmem:[#allocation2 + $0x28] sm:$0xff] %v791_v45  ;;  %1738 = vmatprep.subr.bf16.mxu0 (!%p1517_p13), %v1737_v27  ;;  %1796 = vmatprep.subr.bf16.mxu1 (!%p1517_p13), %v1737_v27 }
 0x213   : > { %v850_v36 = vpop.permute.xlu1 %849  ;;  %v845_v37 = vpop.permute.xlu0 %844 }
 0x214   : > { %1740 = vmatpush3.bf16.msra.mxu0 %v1737_v27  ;;  %1804 = vmatpush3.bf16.msra.mxu1 %v1737_v27 }
 0x215   : > { %v820_v40 = vld [vmem:[#allocation2 + $0x30] sm:$0xff] }
 0x216   : > { %v814_v29 = vld [vmem:[#allocation2] sm:$0xff]  ;;  %v816_v41 = vld [vmem:[#allocation2 + $0x10] sm:$0xff] }
 0x217   : > { %v862_v33 = vmul.f32 %v825_v31, %v814_v29  ;;  %v818_v35 = vld [vmem:[#allocation2 + $0x20] sm:$0xff]  ;;  %v855_v42 = vpop.permute.xlu1 %854  ;;  %v835_v43 = vpop.permute.xlu0 %834  ;;  %v821_v46 = vld [vmem:[#allocation2 + $0x38] sm:$0xff]  ;;  %v896_v31 = vld [vmem:[#allocation3 + $0x10] sm:$0xff] }
 0x218   : > { %v815_v28 = vld [vmem:[#allocation2 + $0x8] sm:$0xff]  ;;  %v866_v39 = vmul.f32 %v845_v37, %v818_v35  ;;  %v868_v44 = vmul.f32 %v855_v42, %v820_v40  ;;  %v864_v45 = vmul.f32 %v835_v43, %v816_v41  ;;  %v817_v47 = vld [vmem:[#allocation2 + $0x18] sm:$0xff] }
 0x219   : > { %v863_v32 = vmul.f32 %v830_v30, %v815_v28  ;;  %v819_v34 = vld [vmem:[#allocation2 + $0x28] sm:$0xff]  ;;  %1653 = vmatprep.mubr.f32.mxu0 %v862_v33  ;;  %v900_v33 = vld [vmem:[#allocation3 + $0x30] sm:$0xff] }
 0x21a   : > { %v867_v38 = vmul.f32 %v850_v36, %v819_v34  ;;  %1659 = vmatprep.mubr.f32.mxu1 %v866_v39 }
 0x21b   : > { %1654 = vmatmul.mubr.f32.vlgmr.msra.gmra.mrb[0].mxu0 %v863_v32  ;;  %v860_v48 = vpop.permute.xlu1 %859  ;;  %v840_v49 = vpop.permute.xlu0 %839 }
 0x21c   : > { %1660 = vmatmul.mubr.f32.vlgmr.msra.gmra.mrb[0].mxu1 %v867_v38  ;;  %1656 = vmatprep.mubr.f32.mxu0 %v864_v45  ;;  %v869_v50 = vmul.f32 %v860_v48, %v821_v46  ;;  %v865_v51 = vmul.f32 %v840_v49, %v817_v47 }
 0x21d   : > { %1662 = vmatprep.mubr.f32.mxu1 %v868_v44 }
 0x21f   : > { %1657 = vmatmul.mubr.f32.gmra.mrb[2].mxu0 %v865_v51  ;;  %v2019_v52 = vpop.permute.xlu0 %2018  ;;  %v2024_v57 = vpop.permute.xlu1 %2023 }
 0x220   : > { %1663 = vmatmul.mubr.f32.gmra.mrb[2].mxu1 %v869_v50  ;;  %v2021_v53 = vunpack.i.h.bf16 %v2019_v52  ;;  %v2020_v54 = vunpack.i.l.bf16 %v2019_v52  ;;  %v2026_v14 = vunpack.i.h.bf16 %v2024_v57  ;;  %v2025_v17 = vunpack.i.l.bf16 %v2024_v57 }
 0x222   : > { %v966_v59 = vmul.f32 %v2021_v53, %v1526_v56  ;;  %v965_v63 = vmul.f32 %v2020_v54, %v1526_v56  ;;  %v968_v21 = vmul.f32 %v2026_v14, %v1526_v56  ;;  %v967_v27 = vmul.f32 %v2025_v17, %v1526_v56 }
 0x223   : > { %v2029_v55 = vpop.permute.xlu0 %2028  ;;  %v2034_v4 = vpop.permute.xlu1 %2033 }
 0x224   : > { %v2031_v58 = vunpack.i.h.bf16 %v2029_v55  ;;  %v2030_v60 = vunpack.i.l.bf16 %v2029_v55  ;;  %v2036_v15 = vunpack.i.h.bf16 %v2034_v4  ;;  %v2035_v18 = vunpack.i.l.bf16 %v2034_v4 }
 0x226   : > { %v970_v6 = vmul.f32 %v2031_v58, %v1526_v56  ;;  %v969_v10 = vmul.f32 %v2030_v60, %v1526_v56  ;;  %v972_v22 = vmul.f32 %v2036_v15, %v1526_v56  ;;  %v971_v28 = vmul.f32 %v2035_v18, %v1526_v56 }
 0x2ee   : > { %v1655_v62 = vpop.f32.mrb[0].mxu0 }
 0x2ef   : > { %v1045_v0 = vadd.f32 %v1655_v62, %v966_v59  ;;  %v1039_v2 = vpop.f32.mrb[1].mxu0  ;;  %v1661_v9 = vpop.f32.mrb[0].mxu1 }
 0x2f0   : > { %v1040_v3 = vadd.f32 %v1039_v2, %v965_v63  ;;  %v1065_v11 = vadd.f32 %v1661_v9, %v970_v6  ;;  %v1059_v13 = vpop.f32.mrb[1].mxu1 }
 0x2f1   : > { %v1079_v5 = vadd.f32 %v1045_v0, %v895_v61  ;;  %v1060_v16 = vadd.f32 %v1059_v13, %v969_v10 }
 0x2f2   : > { %v1078_v7 = vadd.f32 %v1040_v3, %v894_v1  ;;  %v1083_v19 = vadd.f32 %v1065_v11, %v899_v8  ;;  %v1658_v24 = vpop.f32.mrb[2].mxu0 }
 0x2f3   : > { %1087 = vst [vmem:[#allocation3 + $0x8] sm:$0xff] %v1079_v5  ;;  %v1082_v20 = vadd.f32 %v1060_v16, %v898_v12  ;;  %v1664_v26 = vpop.f32.mrb[2].mxu1  ;;  %v1055_v29 = vadd.f32 %v1658_v24, %v968_v21  ;;  %v1049_v32 = vpop.f32.mrb[3].mxu0 }
 0x2f4   : > { %1086 = vst [vmem:[#allocation3] sm:$0xff] %v1078_v7  ;;  %1091 = vst [vmem:[#allocation3 + $0x28] sm:$0xff] %v1083_v19  ;;  %v1075_v30 = vadd.f32 %v1664_v26, %v972_v22  ;;  %v1069_v34 = vpop.f32.mrb[3].mxu1  ;;  %v1050_v35 = vadd.f32 %v1049_v32, %v967_v27 }
 0x2f5   : > { %1090 = vst [vmem:[#allocation3 + $0x20] sm:$0xff] %v1082_v20  ;;  %v1070_v36 = vadd.f32 %v1069_v34, %v971_v28  ;;  %v1081_v37 = vadd.f32 %v1055_v29, %v897_v23 }
 0x2f6   : > { %v1085_v38 = vadd.f32 %v1075_v30, %v901_v25  ;;  %v1080_v39 = vadd.f32 %v1050_v35, %v896_v31 }
 0x2f7   : > { %v1084_v40 = vadd.f32 %v1070_v36, %v900_v33  ;;  %1089 = vst [vmem:[#allocation3 + $0x18] sm:$0xff] %v1081_v37 }
 0x2f8   : > { %1093 = vst [vmem:[#allocation3 + $0x38] sm:$0xff] %v1085_v38  ;;  %1088 = vst [vmem:[#allocation3 + $0x10] sm:$0xff] %v1080_v39 }
 0x2f9   : > { %1092 = vst [vmem:[#allocation3 + $0x30] sm:$0xff] %v1084_v40 }
 0x2fa PF: > { %s3077_s3 = sld [smem:[#allocation25_spill]] }
 0x300   : > { %p1094_p11 = scmp.eq.s32.totalorder %s3077_s3, 1 }
 0x302   : > { %p1095_p2 = pnand %p1094_p11, %p802_p5 }
 0x303   : > { %v1107_v41 = vld [vmem:[#allocation11] sm:$0xff] (!%p1095_p2)  ;;  %v1108_v42 = vld [vmem:[#allocation11 + $0x8] sm:$0xff] (!%p1095_p2)  ;;  %v1109_v43 = vld [vmem:[#allocation11 + $0x10] sm:$0xff] (!%p1095_p2)  ;;  %s3079_s17 = sld [smem:[#allocation44_spill]] (!%p1095_p2) }
 0x304   : > { %1098 = sbr.rel (%p1095_p2) target bundleno = 1028 (0x404), region = 125  ;;  %v1741_v44 = vpack.c.bf16 (!%p1095_p2), %v1108_v42, %v1107_v41  ;;  %v1110_v45 = vld [vmem:[#allocation11 + $0x18] sm:$0xff] (!%p1095_p2)  ;;  %v1111_v47 = vld [vmem:[#allocation11 + $0x20] sm:$0xff] (!%p1095_p2)  ;;  %v1112_v48 = vld [vmem:[#allocation11 + $0x28] sm:$0xff] (!%p1095_p2) }
 0x305   : > { %v1745_v46 = vpack.c.bf16 (!%p1095_p2), %v1110_v45, %v1109_v43  ;;  %v1749_v49 = vpack.c.bf16 (!%p1095_p2), %v1112_v48, %v1111_v47  ;;  %v1099_v50 = vld [vmem:[%s2773_s28] sm:$0xff] (!%p1095_p2)  ;;  %v1113_v52 = vld [vmem:[#allocation11 + $0x30] sm:$0xff] (!%p1095_p2)  ;;  %v1114_v53 = vld [vmem:[#allocation11 + $0x38] sm:$0xff] (!%p1095_p2) }
 0x306   : > { %1742 = vmatprep.subr.bf16.mxu0 (!%p1095_p2), %v1741_v44  ;;  %1805 = vmatprep.subr.bf16.mxu1 (!%p1095_p2), %v1741_v44  ;;  %v1103_v51 = vld [vmem:[%s2773_s28 + $0x20] sm:$0xff] (!%p1095_p2)  ;;  %v1753_v54 = vpack.c.bf16 (!%p1095_p2), %v1114_v53, %v1113_v52  ;;  %v1116_v56 = vld [vmem:[#allocation11 + $0x48] sm:$0xff] (!%p1095_p2)  ;;  %v1117_v58 = vld [vmem:[#allocation11 + $0x50] sm:$0xff] (!%p1095_p2) }
 0x307   : > { %1744 = vmatpush3.bf16.msra.mxu0 (!%p1095_p2), %v1741_v44  ;;  %1813 = vmatpush3.bf16.msra.mxu1 (!%p1095_p2), %v1741_v44  ;;  %v1115_v55 = vld [vmem:[#allocation11 + $0x40] sm:$0xff] (!%p1095_p2)  ;;  %v1118_v59 = vld [vmem:[#allocation11 + $0x58] sm:$0xff] (!%p1095_p2)  ;;  %v1120_v62 = vld [vmem:[#allocation11 + $0x68] sm:$0xff] (!%p1095_p2) }
 0x308   : > { %1746 = vmatprep.subr.bf16.mxu0 (!%p1095_p2), %v1745_v46  ;;  %1806 = vmatprep.subr.bf16.mxu1 (!%p1095_p2), %v1745_v46  ;;  %v1757_v57 = vpack.c.bf16 (!%p1095_p2), %v1116_v56, %v1115_v55  ;;  %v1761_v60 = vpack.c.bf16 (!%p1095_p2), %v1118_v59, %v1117_v58  ;;  %v1119_v61 = vld [vmem:[#allocation11 + $0x60] sm:$0xff] (!%p1095_p2)  ;;  %v1121_v0 = vld [vmem:[#allocation11 + $0x70] sm:$0xff] (!%p1095_p2)  ;;  %v1122_v1 = vld [vmem:[#allocation11 + $0x78] sm:$0xff] (!%p1095_p2) }
 0x309   : > { %1697 = vmatprep.mubr.f32.mxu0 (!%p1095_p2), %v1099_v50  ;;  %1703 = vmatprep.mubr.f32.mxu1 (!%p1095_p2), %v1103_v51  ;;  %v1765_v63 = vpack.c.bf16 (!%p1095_p2), %v1120_v62, %v1119_v61  ;;  %v1769_v2 = vpack.c.bf16 (!%p1095_p2), %v1122_v1, %v1121_v0  ;;  %v1100_v3 = vld [vmem:[%s2773_s28 + $0x8] sm:$0xff] (!%p1095_p2)  ;;  %v1101_v5 = vld [vmem:[%s2773_s28 + $0x10] sm:$0xff] (!%p1095_p2)  ;;  %v1102_v7 = vld [vmem:[%s2773_s28 + $0x18] sm:$0xff] (!%p1095_p2) }
 0x30a   : > { %v1104_v4 = vld [vmem:[%s2773_s28 + $0x28] sm:$0xff] (!%p1095_p2)  ;;  %v1105_v6 = vld [vmem:[%s2773_s28 + $0x30] sm:$0xff] (!%p1095_p2)  ;;  %v1106_v8 = vld [vmem:[%s2773_s28 + $0x38] sm:$0xff] (!%p1095_p2) }
 0x30b   : > { %1748 = vmatpush3.bf16.msra.mxu0 %v1745_v46  ;;  %1814 = vmatpush3.bf16.msra.mxu1 %v1745_v46  ;;  %v1236_v9 = vld [vmem:[#allocation3 + $0x8] sm:$0xff]  ;;  %v1235_v11 = vld [vmem:[#allocation3] sm:$0xff]  ;;  %v1238_v20 = vld [vmem:[#allocation3 + $0x18] sm:$0xff] }
 0x30c   : > { %1750 = vmatprep.subr.bf16.mxu0 %v1749_v49  ;;  %1807 = vmatprep.subr.bf16.mxu1 %v1749_v49  ;;  %v1240_v10 = vld [vmem:[#allocation3 + $0x28] sm:$0xff]  ;;  %v1239_v12 = vld [vmem:[#allocation3 + $0x20] sm:$0xff]  ;;  %v1244_v14 = vmul.f32 0.5, %v1236_v9  ;;  %v1243_v18 = vmul.f32 0.5, %v1235_v11  ;;  %v1242_v21 = vld [vmem:[#allocation3 + $0x38] sm:$0xff]  ;;  %v1246_v32 = vmul.f32 0.5, %v1238_v20 }
 0x30d   : > { %v1527_v13 = vld [vmem:[%s3079_s17] ss:$0 sm:$0xff]  ;;  %v1248_v15 = vmul.f32 0.5, %v1240_v10  ;;  %v1247_v19 = vmul.f32 0.5, %v1239_v12  ;;  %v1237_v26 = vld [vmem:[#allocation3 + $0x10] sm:$0xff]  ;;  %v1250_v33 = vmul.f32 0.5, %v1242_v21 }
 0x30e   : > { %v1241_v27 = vld [vmem:[#allocation3 + $0x30] sm:$0xff]  ;;  %v1245_v38 = vmul.f32 0.5, %v1237_v26 }
 0x30f   : > { %1752 = vmatpush3.bf16.msra.mxu0 %v1749_v49  ;;  %1815 = vmatpush3.bf16.msra.mxu1 %v1749_v49  ;;  %v1249_v39 = vmul.f32 0.5, %v1241_v27 }
 0x310   : > { %1754 = vmatprep.subr.bf16.mxu0 %v1753_v54  ;;  %1808 = vmatprep.subr.bf16.mxu1 %v1753_v54 }
 0x313   : > { %1756 = vmatpush3.bf16.msra.mxu0 %v1753_v54  ;;  %1816 = vmatpush3.bf16.msra.mxu1 %v1753_v54 }
 0x314   : > { %1758 = vmatprep.subr.bf16.mxu0 %v1757_v57  ;;  %1809 = vmatprep.subr.bf16.mxu1 %v1757_v57 }
 0x317   : > { %1760 = vmatpush3.bf16.msra.mxu0 %v1757_v57  ;;  %1817 = vmatpush3.bf16.msra.mxu1 %v1757_v57 }
 0x318   : > { %1762 = vmatprep.subr.bf16.mxu0 %v1761_v60  ;;  %1810 = vmatprep.subr.bf16.mxu1 %v1761_v60 }
 0x31b   : > { %1764 = vmatpush3.bf16.msra.mxu0 %v1761_v60  ;;  %1818 = vmatpush3.bf16.msra.mxu1 %v1761_v60 }
 0x31c   : > { %1766 = vmatprep.subr.bf16.mxu0 %v1765_v63  ;;  %1811 = vmatprep.subr.bf16.mxu1 %v1765_v63 }
 0x31f   : > { %1768 = vmatpush3.bf16.msra.mxu0 %v1765_v63  ;;  %1819 = vmatpush3.bf16.msra.mxu1 %v1765_v63 }
 0x320   : > { %1770 = vmatprep.subr.bf16.mxu0 %v1769_v2  ;;  %1812 = vmatprep.subr.bf16.mxu1 %v1769_v2 }
 0x323   : > { %1772 = vmatpush3.bf16.msra.mxu0 %v1769_v2  ;;  %1820 = vmatpush3.bf16.msra.mxu1 %v1769_v2 }
 0x326   : > { %1698 = vmatmul.mubr.f32.vlgmr.msra.gmra.mrb[0].mxu0 %v1100_v3  ;;  %1704 = vmatmul.mubr.f32.vlgmr.msra.gmra.mrb[0].mxu1 %v1104_v4 }
 0x327   : > { %1700 = vmatprep.mubr.f32.mxu0 %v1101_v5  ;;  %1706 = vmatprep.mubr.f32.mxu1 %v1105_v6 }
 0x32a   : > { %1701 = vmatmul.mubr.f32.gmra.mrb[2].mxu0 %v1102_v7  ;;  %1707 = vmatmul.mubr.f32.gmra.mrb[2].mxu1 %v1106_v8 }
 0x3f9   : > { %v1699_v16 = vpop.f32.mrb[0].mxu0  ;;  %v1705_v17 = vpop.f32.mrb[0].mxu1 }
 0x3fa   : > { %v1202_v22 = vadd.f32 %v1699_v16, %v1527_v13  ;;  %v1222_v23 = vadd.f32 %v1705_v17, %v1527_v13  ;;  %v1196_v24 = vpop.f32.mrb[1].mxu0  ;;  %v1216_v25 = vpop.f32.mrb[1].mxu1 }
 0x3fb   : > { %v1197_v28 = vadd.f32 %v1527_v13, %v1196_v24  ;;  %v1217_v29 = vadd.f32 %v1527_v13, %v1216_v25 }
 0x3fc   : > { %v1252_v30 = vadd.f32 %v1244_v14, %v1202_v22  ;;  %v1256_v31 = vadd.f32 %v1248_v15, %v1222_v23 }
 0x3fd   : > { %v1251_v34 = vadd.f32 %v1243_v18, %v1197_v28  ;;  %v1255_v35 = vadd.f32 %v1247_v19, %v1217_v29  ;;  %v1702_v36 = vpop.f32.mrb[2].mxu0  ;;  %v1708_v37 = vpop.f32.mrb[2].mxu1 }
 0x3fe   : > { %1260 = vst [vmem:[%s2800_s27 + $0x8] sm:$0xff] %v1252_v30  ;;  %1264 = vst [vmem:[%s2800_s27 + $0x28] sm:$0xff] %v1256_v31  ;;  %v1212_v40 = vadd.f32 %v1702_v36, %v1527_v13  ;;  %v1232_v41 = vadd.f32 %v1708_v37, %v1527_v13  ;;  %v1206_v42 = vpop.f32.mrb[3].mxu0  ;;  %v1226_v43 = vpop.f32.mrb[3].mxu1 }
 0x3ff   : > { %1259 = vst [vmem:[%s2800_s27] sm:$0xff] %v1251_v34  ;;  %1263 = vst [vmem:[%s2800_s27 + $0x20] sm:$0xff] %v1255_v35  ;;  %v1207_v44 = vadd.f32 %v1527_v13, %v1206_v42  ;;  %v1227_v45 = vadd.f32 %v1527_v13, %v1226_v43 }
 0x400   : > { %v1254_v46 = vadd.f32 %v1246_v32, %v1212_v40  ;;  %v1258_v47 = vadd.f32 %v1250_v33, %v1232_v41 }
 0x401   : > { %v1253_v48 = vadd.f32 %v1245_v38, %v1207_v44  ;;  %v1257_v49 = vadd.f32 %v1249_v39, %v1227_v45 }
 0x402   : > { %1262 = vst [vmem:[%s2800_s27 + $0x18] sm:$0xff] %v1254_v46  ;;  %1266 = vst [vmem:[%s2800_s27 + $0x38] sm:$0xff] %v1258_v47 }
 0x403   : > { %1261 = vst [vmem:[%s2800_s27 + $0x10] sm:$0xff] %v1253_v48  ;;  %1265 = vst [vmem:[%s2800_s27 + $0x30] sm:$0xff] %v1257_v49 }
 0x404 PF: > { %s3080_s28 = sld [smem:[#allocation26_spill]]  ;;  %s3081_s16 = sld [smem:[#allocation20_spill]] }
 0x405   : > { %s3082_s8 = sld [smem:[#allocation38_spill]]  ;;  %s3083_s4 = sld [smem:[#allocation45_spill]] }
 0x406   : > { %s1281_s24 = sshll.u32 %s2800_s27, 4  ;;  %s2355_s18 = smov [#allocation13]   ;;  %s2875_s24 = int_to_ptr.vmem [resolvable:$true] %s1281_s24 }
 0x407   : > { %s2149_s7 = scalar_lea.vmem %s2875_s24, 1024  ;;  %s2153_s2 = sshll.u32 %s2355_s18, 4  ;;  %s2154_s2 = int_to_ptr.vmem [resolvable:$false] %s2153_s2 }
 0x408   : > { %p2150_p7 = scmp.ne.s32.totalorder %s2875_s24, %s2149_s7  ;;  %s2155_s3 = scalar_lea.vmem %s2154_s2, 2048 }
 0x409   : > { %p2156_p12 = scmp.lt.s32.totalorder %s2875_s24, %s2154_s2  ;;  %p2157_p0 = scmp.lt.s32.totalorder %s2155_s3, %s2149_s7 }
 0x40a   : > { %s1536_s12 = sshll.u32 %s3080_s28, 10  ;;  %s3084_s25 = sand.u32 1, %s3081_s16  }
 0x40b   : > { %s2872_s23 = scalar_lea.hbm %s3083_s4, %s1536_s12  ;;  %s2879_s0 = scalar_lea.sflag [#allocation7], %s3084_s25 }
 0x40c   : > { %p3085_p6 = scmp.ne.s32.totalorder %s3082_s8, 0  ;;  %p2158_p10 = por %p2157_p0, %p2156_p12 }
 0x40e   : > { %p2151_p9 = pnand %p2150_p7, %p3085_p6 }
 0x410   : > { %p2152_p4 = pneg %p2151_p9 }
 0x412   : > { %p2159_p1 = pnand %p2158_p10, %p2152_p4 }
 0x414   : > { %2162 = shalt.err (!%p2159_p1)
}
 0x415   : > { %s2163_s27 = scalar_lea.hbm %s2872_s23, 1024  ;;  %s2167_s26 = scalar_lea.hbm %s3083_s4, 3072 }
 0x416   : > { %p2164_p8 = scmp.ne.s32.totalorder %s2872_s23, %s2163_s27  ;;  %p2168_p13 = scmp.lt.u32.totalorder %s2872_s23, %s3083_s4 }
 0x417   : > { %p2169_p11 = scmp.lt.u32.totalorder %s2167_s26, %s2163_s27  ;;  %p2171_p7 = scmp.lt.u32.totalorder %s2163_s27, %s2872_s23 }
 0x418   : > { %p2165_p3 = pnand %p2164_p8, %p3085_p6 }
 0x419   : > { %p2170_p2 = por %p2169_p11, %p2168_p13 }
 0x41a   : > { %p2166_p5 = pneg %p2165_p3 }
 0x41b   : > { %p2172_p9 = por %p2171_p7, %p2170_p2 }
 0x41d   : > { %p2173_p4 = pnand %p2172_p9, %p2166_p5 }
 0x41f   : > { %2176 = shalt.err (!%p2173_p4)
}
 0x420   : > { %s2356_s16 = smov 128   ;;  %s2357_s12 = smov 8  }
 0x421   : > { %1833 = dma.vmem_to_hbm [thread:$0]  (%p3085_p6), %s2875_s24, 1024, %s2872_s23, %s2879_s0, %s2356_s16, %s2356_s16, %s2357_s12  }
 0x422 PF: > { %s3086_s11 = sld [smem:[#allocation19_spill]]  ;;  %s3087_s9 = sld [smem:[#allocation39_spill]] }
 0x423   : > { %p1845_p12 = scmp.ge.s32.totalorder %s2339_s22, 2 }
 0x428   : > { %s1296_s25 = sand.u32 1, %s3086_s11   ;;  %p3088_p0 = scmp.ne.s32.totalorder %s3087_s9, 0 }
 0x429   : > { %s1297_s7 = scalar_lea.sflag [#allocation7], %s1296_s25 }
 0x42a   : > { %p1840_p10 = pnand %p1845_p12, %p3088_p0 }
 0x42c   : > { %2266 = dma.done.wait (!%p1840_p10), %s1297_s7, 1024  }
 0x42d   : > { %2268 = vsyncadd (!%p1840_p10), %s1297_s7, 4294966272  ;;  %s28_s22 = sadd.s32 1, %s2339_s22   ;;  %s3090_s27 = sld [smem:[#allocation20_spill]] }
 0x42e   : > { %p2908_p1 = scmp.ge.s32.totalorder %s28_s22, 14   ;;  %s3091_s8 = sld [smem:[#allocation36_spill]] }
 0x42f   : > { %s3092_s30 = sld [smem:[#allocation21_spill]]  ;;  %s3093_s23 = sld [smem:[#allocation33_spill]] }
 0x430   : > { %s3094_s11 = sld [smem:[#allocation22_spill]]  ;;  %s3095_s24 = sld [smem:[#allocation31_spill]] }
 0x431   : > { %s3096_s0 = sld [smem:[#allocation34_spill]]  ;;  %s3097_s2 = sld [smem:[#allocation28_spill]] }
 0x432   : > { %s3098_s3 = sld [smem:[#allocation29_spill]]  ;;  %s3099_s26 = sld [smem:[#allocation30_spill]] }
 0x433   : > { %s3100_s28 = smov %s2279_s29  ;;  %s3103_s9 = smov %s2291_s10 }
 0x434   : > { %s3101_s29 = smov %s3091_s8  ;;  %s3105_s12 = smov %s2303_s13 }
 0x435   : > { %s3104_s10 = smov %s3093_s23  ;;  %s3107_s14 = smov %s2311_s15 }
 0x436   : > { %s3106_s13 = smov %s3095_s24  ;;  %s3109_s16 = smov %s2327_s19 }
 0x437   : > { %s3108_s15 = smov %s3096_s0  ;;  %s3110_s17 = smov %s2331_s20 }
 0x438   : > { %s3111_s18 = smov %s2335_s21  ;;  %s3112_s19 = smov %s3097_s2 }
 0x439   : > { %s3113_s20 = smov %s3098_s3  ;;  %s3114_s21 = smov %s3099_s26 }
 0x43a   :  { %27 = sbr.rel (!%p2908_p1) target bundleno = 22 (0x16), region = 196 }
 0x441   :  { %1302 = vsyncpa [#allocation6], 1 }
 0x442   :  { %1304 = vsyncpa [#allocation6 + $0x1], 1 }
 0x443   :  { %1305 = vsyncpa [#allocation9], 1 }
 0x444   :  { %1307 = vsyncpa [#allocation9 + $0x1], 1 }
 0x445   :  { %1308 = vsyncpa [#allocation12], 1 }
 0x446   :  { %1309 = vsyncpa [#allocation7], 1 }
 0x447   :  { %1311 = vsyncpa [#allocation7 + $0x1], 1 }

</bundles_post_ra>
